<compile_context>
chip_gen: v7x
topology: tpu7x:2x2x1
jax: 0.10.0
libtpu: 0.0.40
codegen_flags: <defaults>
</compile_context>

<pallas_src>
import functools

import jax
import jax.numpy as jnp
from jax.experimental import pallas as pl
from jax.experimental.pallas import tpu as pltpu


def _classifier_kernel(adj_ref, h_ref, w1_ref, b1_ref, w2_ref, b2_ref,
                       wc_ref, bc_ref, out_ref, *, gpb, npg):
    """One grid step = `gpb` graphs packed as one block-diagonal Â tile.

    GraphConv -> ReLU -> GraphConv -> ReLU -> per-graph mean -> Linear.
    All MXU matmuls use bf16 operands with f32 accumulation; bias/ReLU/mean
    epilogues stay in f32.
    """
    adj = adj_ref[...].astype(jnp.bfloat16)      # [M, M] block-diag Â, M = gpb*npg
    h = h_ref[...].astype(jnp.bfloat16)          # [M, F_in]
    w1 = w1_ref[...].astype(jnp.bfloat16)        # [F_in, H]
    w2 = w2_ref[...].astype(jnp.bfloat16)        # [H, H]
    wc = wc_ref[...].astype(jnp.bfloat16)        # [H, C]

    # GraphConv 1, reordered as (Â h) W1 since F_in <= hidden_dim.
    ah = jnp.dot(adj, h, preferred_element_type=jnp.float32)                  # [M, F_in]
    h1 = jnp.dot(ah.astype(jnp.bfloat16), w1,
                 preferred_element_type=jnp.float32) + b1_ref[...]            # [M, H]
    h1 = jnp.maximum(h1, 0.0)

    # GraphConv 2: Â (h1 W2) + b2.
    hw2 = jnp.dot(h1.astype(jnp.bfloat16), w2, preferred_element_type=jnp.float32)
    h2 = jnp.dot(adj, hw2.astype(jnp.bfloat16),
                 preferred_element_type=jnp.float32) + b2_ref[...]            # [M, H]
    h2 = jnp.maximum(h2, 0.0)

    # dgl.mean_nodes: per-graph sum via one MXU pass with a block-indicator
    # pooling matrix (built from iota; avoids a 3-D reshape/relayout), then a
    # f32 scale by 1/npg.
    total_nodes = h2.shape[0]
    row = jax.lax.broadcasted_iota(jnp.int32, (gpb, total_nodes), 0)   # graph id
    col = jax.lax.broadcasted_iota(jnp.int32, (gpb, total_nodes), 1)   # node id
    lo = row * npg
    pool = jnp.where((col >= lo) & (col < lo + npg), 1.0, 0.0).astype(jnp.bfloat16)
    hg = jnp.dot(pool, h2.astype(jnp.bfloat16),
                 preferred_element_type=jnp.float32) * (1.0 / npg)            # [gpb, H]

    # Batched classifier: a single [gpb, H] @ [H, C] matmul per step.
    out_ref[...] = jnp.dot(hg.astype(jnp.bfloat16), wc,
                           preferred_element_type=jnp.float32) + bc_ref[...]  # [gpb, C]


def _pack_block_diag(adj, gpb):
    """[G, npg, npg] per-graph Â -> [G//gpb, gpb*npg, gpb*npg] block-diagonal tiles."""
    g, npg, _ = adj.shape
    steps = g // gpb
    eye = jnp.eye(gpb, dtype=adj.dtype)
    bd = jnp.einsum('saij,ab->saibj', adj.reshape(steps, gpb, npg, npg), eye)
    return bd.reshape(steps, gpb * npg, gpb * npg)


@functools.partial(jax.jit, static_argnames=("graphs_per_block",))
def classifier_forward(adj, h, w1, b1, w2, b2, wc, bc, *, graphs_per_block=16):
    """adj: [G, npg, npg] per-graph normalized adjacency; h: [G*npg, F_in] features."""
    n_graphs, npg, _ = adj.shape
    in_dim = h.shape[1]
    hidden_dim = w1.shape[1]
    n_classes = wc.shape[1]

    gpb = min(graphs_per_block, n_graphs)
    pad = (-n_graphs) % gpb
    if pad:                                         # pad to a whole number of steps
        adj = jnp.concatenate([adj, jnp.zeros((pad, npg, npg), adj.dtype)], axis=0)
        h = jnp.concatenate([h, jnp.zeros((pad * npg, in_dim), h.dtype)], axis=0)
    g_pad = n_graphs + pad
    steps = g_pad // gpb
    m = gpb * npg

    # Block-diagonal Â per step (f32; cast to bf16 inside the kernel under DMA slack).
    adj_bd = _pack_block_diag(adj, gpb)             # [steps, m, m]

    flops = steps * (
        2 * m * m * in_dim                          # Â @ h
        + 2 * m * in_dim * hidden_dim               # (Âh) @ W1
        + 2 * m * hidden_dim * hidden_dim           # h1 @ W2
        + 2 * m * m * hidden_dim                    # Â @ (h1 W2)
        + 2 * gpb * m * hidden_dim                  # mean pooling matmul
        + 2 * gpb * hidden_dim * n_classes          # hg @ Wc
    )
    bytes_accessed = (
        adj_bd.size * 4 + h.size * 4
        + (w1.size + b1.size + w2.size + b2.size + wc.size + bc.size) * 4
        + g_pad * n_classes * 4
    )
    cost = pl.CostEstimate(flops=flops, transcendentals=0,
                           bytes_accessed=bytes_accessed)

    kernel = functools.partial(_classifier_kernel, gpb=gpb, npg=npg)

    grid_spec = pltpu.PrefetchScalarGridSpec(
        num_scalar_prefetch=0,
        grid=(steps,),
        in_specs=[
            pl.BlockSpec((None, m, m), lambda s: (s, 0, 0)),            # block-diag Â of step s
            pl.BlockSpec((m, in_dim), lambda s: (s, 0)),                # node features of step s
            pl.BlockSpec((in_dim, hidden_dim), lambda s: (0, 0)),       # W1 (resident)
            pl.BlockSpec((1, hidden_dim), lambda s: (0, 0)),            # b1
            pl.BlockSpec((hidden_dim, hidden_dim), lambda s: (0, 0)),   # W2
            pl.BlockSpec((1, hidden_dim), lambda s: (0, 0)),            # b2
            pl.BlockSpec((hidden_dim, n_classes), lambda s: (0, 0)),    # Wc
            pl.BlockSpec((1, n_classes), lambda s: (0, 0)),             # bc
        ],
        out_specs=pl.BlockSpec((gpb, n_classes), lambda s: (s, 0)),     # [gpb, C] per step
    )

    out = pl.pallas_call(
        kernel,
        out_shape=jax.ShapeDtypeStruct((g_pad, n_classes), jnp.float32),
        grid_spec=grid_spec,
        compiler_params=pltpu.CompilerParams(
            dimension_semantics=("parallel",)),     # >=2 steps -> both v7x TCs busy
        cost_estimate=cost,
    )(adj_bd, h, w1, b1, w2, b2, wc, bc)
    return out[:n_graphs]


def build_batch_adjacency(n_graphs, nodes_per_graph):
    """Per-graph 'both'-normalized Â = D^{-1/2} A D^{-1/2} (degrees clamped >= 1)
    for a batch of varied undirected circulant graphs, shaped [G, npg, npg]."""
    idx = jnp.arange(nodes_per_graph)
    mats = []
    for g in range(n_graphs):
        a = jnp.zeros((nodes_per_graph, nodes_per_graph), dtype=jnp.float32)
        nxt = (idx + 1) % nodes_per_graph
        a = a.at[idx, nxt].set(1.0)
        a = a.at[nxt, idx].set(1.0)
        skip = 2 + (g % (nodes_per_graph - 3))       # vary structure per graph
        far = (idx + skip) % nodes_per_graph
        a = a.at[idx, far].set(1.0)
        a = a.at[far, idx].set(1.0)
        deg = jnp.maximum(a.sum(axis=1), 1.0)        # clamp like DGL
        d_inv_sqrt = 1.0 / jnp.sqrt(deg)
        mats.append(a * d_inv_sqrt[:, None] * d_inv_sqrt[None, :])
    return jnp.stack(mats)


def reference_forward(adj, h, w1, b1, w2, b2, wc, bc):
    n_graphs, npg, _ = adj.shape
    hb = h.reshape(n_graphs, npg, -1)
    h1 = jnp.maximum(jnp.einsum('gij,gjf->gif', adj, hb @ w1) + b1, 0.0)
    h2 = jnp.maximum(jnp.einsum('gij,gjf->gif', adj, h1 @ w2) + b2, 0.0)
    hg = h2.mean(axis=1)
    return hg @ wc + bc


if __name__ == "__main__":
    # Small shapes consistent with Classifier(in_dim, hidden_dim, n_classes).
    n_graphs = 32
    nodes_per_graph = 16          # gpb=16 -> 256x256 block-diag tile, 2 grid steps
    n_nodes = n_graphs * nodes_per_graph
    in_dim, hidden_dim, n_classes = 16, 32, 4

    key = jax.random.PRNGKey(0)
    k_h, k_w1, k_b1, k_w2, k_b2, k_wc, k_bc = jax.random.split(key, 7)

    h = jax.random.normal(k_h, (n_nodes, in_dim), dtype=jnp.float32)
    w1 = 0.1 * jax.random.normal(k_w1, (in_dim, hidden_dim), dtype=jnp.float32)
    b1 = 0.1 * jax.random.normal(k_b1, (1, hidden_dim), dtype=jnp.float32)
    w2 = 0.1 * jax.random.normal(k_w2, (hidden_dim, hidden_dim), dtype=jnp.float32)
    b2 = 0.1 * jax.random.normal(k_b2, (1, hidden_dim), dtype=jnp.float32)
    wc = 0.1 * jax.random.normal(k_wc, (hidden_dim, n_classes), dtype=jnp.float32)
    bc = 0.1 * jax.random.normal(k_bc, (1, n_classes), dtype=jnp.float32)

    adj = build_batch_adjacency(n_graphs, nodes_per_graph)   # [G, npg, npg] f32

    out = classifier_forward(adj, h, w1, b1, w2, b2, wc, bc, graphs_per_block=16)
    out = jax.block_until_ready(out)

    ref = reference_forward(adj, h, w1, b1, w2, b2, wc, bc)
    assert out.shape == (n_graphs, n_classes)
    max_err = float(jnp.max(jnp.abs(out - ref)))
    # bf16 MXU operands (f32 accumulate) -> slightly relaxed tolerance vs pure f32.
    assert jnp.allclose(out, ref, atol=3e-2, rtol=3e-2), max_err

    print("KERNEL_OK")
</pallas_src>

<mosaic_0001>
module attributes {stable_mosaic.version = 11 : i64} {
  func.func @_classifier_kernel(%arg0: i32, %arg1: memref<1x256x256xf32, #tpu.memory_space<vmem>>, %arg2: memref<256x16xf32, #tpu.memory_space<vmem>>, %arg3: memref<16x32xf32, #tpu.memory_space<vmem>>, %arg4: memref<1x32xf32, #tpu.memory_space<vmem>>, %arg5: memref<32x32xf32, #tpu.memory_space<vmem>>, %arg6: memref<1x32xf32, #tpu.memory_space<vmem>>, %arg7: memref<32x4xf32, #tpu.memory_space<vmem>>, %arg8: memref<1x4xf32, #tpu.memory_space<vmem>>, %arg9: memref<16x4xf32, #tpu.memory_space<vmem>>) attributes {dimension_semantics = [#tpu.dimension_semantics<parallel>], iteration_bounds = array<i64: 2>, scalar_prefetch = 0 : i64, scratch_operands = 0 : i64, tpu.core_type = #tpu.core_type<tc>, window_params = [{transform_indices = @transform_0, window_bounds = array<i64: 1, 256, 256>}, {transform_indices = @transform_1, window_bounds = array<i64: 256, 16>}, {pipeline_mode = #tpu.pipeline_mode<synchronous>, transform_indices = @transform_2, window_bounds = array<i64: 16, 32>}, {pipeline_mode = #tpu.pipeline_mode<synchronous>, transform_indices = @transform_3, window_bounds = array<i64: 1, 32>}, {pipeline_mode = #tpu.pipeline_mode<synchronous>, transform_indices = @transform_4, window_bounds = array<i64: 32, 32>}, {pipeline_mode = #tpu.pipeline_mode<synchronous>, transform_indices = @transform_5, window_bounds = array<i64: 1, 32>}, {pipeline_mode = #tpu.pipeline_mode<synchronous>, transform_indices = @transform_6, window_bounds = array<i64: 32, 4>}, {pipeline_mode = #tpu.pipeline_mode<synchronous>, transform_indices = @transform_7, window_bounds = array<i64: 1, 4>}, {transform_indices = @transform_8, window_bounds = array<i64: 16, 4>}]} {
    %c0 = arith.constant 0 : index
    %c0_0 = arith.constant 0 : index
    %c0_1 = arith.constant 0 : index
    %0 = vector.load %arg1[%c0, %c0_0, %c0_1] : memref<1x256x256xf32, #tpu.memory_space<vmem>>, vector<1x256x256xf32>
    %1 = vector.shape_cast %0 : vector<1x256x256xf32> to vector<256x256xf32>
    %2 = arith.truncf %1 : vector<256x256xf32> to vector<256x256xbf16>
    %c0_2 = arith.constant 0 : index
    %c0_3 = arith.constant 0 : index
    %3 = vector.load %arg2[%c0_2, %c0_3] : memref<256x16xf32, #tpu.memory_space<vmem>>, vector<256x16xf32>
    %4 = arith.truncf %3 : vector<256x16xf32> to vector<256x16xbf16>
    %c0_4 = arith.constant 0 : index
    %c0_5 = arith.constant 0 : index
    %5 = vector.load %arg3[%c0_4, %c0_5] : memref<16x32xf32, #tpu.memory_space<vmem>>, vector<16x32xf32>
    %6 = arith.truncf %5 : vector<16x32xf32> to vector<16x32xbf16>
    %c0_6 = arith.constant 0 : index
    %c0_7 = arith.constant 0 : index
    %7 = vector.load %arg5[%c0_6, %c0_7] : memref<32x32xf32, #tpu.memory_space<vmem>>, vector<32x32xf32>
    %8 = arith.truncf %7 : vector<32x32xf32> to vector<32x32xbf16>
    %c0_8 = arith.constant 0 : index
    %c0_9 = arith.constant 0 : index
    %9 = vector.load %arg7[%c0_8, %c0_9] : memref<32x4xf32, #tpu.memory_space<vmem>>, vector<32x4xf32>
    %10 = arith.truncf %9 : vector<32x4xf32> to vector<32x4xbf16>
    %cst = arith.constant dense<0.000000e+00> : vector<256x16xf32>
    %11 = tpu.matmul %2, %4, %cst {dimension_numbers = #tpu.dot_dimension_numbers<[1], [0], [0], [1], [0, 0, 1, 1], [], []>} : vector<256x256xbf16>, vector<256x16xbf16>, vector<256x16xf32> -> vector<256x16xf32>
    %12 = arith.truncf %11 : vector<256x16xf32> to vector<256x16xbf16>
    %cst_10 = arith.constant dense<0.000000e+00> : vector<256x32xf32>
    %13 = tpu.matmul %12, %6, %cst_10 {dimension_numbers = #tpu.dot_dimension_numbers<[1], [0], [0], [1], [0, 0, 1, 1], [], []>} : vector<256x16xbf16>, vector<16x32xbf16>, vector<256x32xf32> -> vector<256x32xf32>
    %c0_11 = arith.constant 0 : index
    %c0_12 = arith.constant 0 : index
    %14 = vector.load %arg4[%c0_11, %c0_12] : memref<1x32xf32, #tpu.memory_space<vmem>>, vector<1x32xf32>
    %15 = vector.broadcast %14 : vector<1x32xf32> to vector<256x32xf32>
    %16 = arith.addf %13, %15 : vector<256x32xf32>
    %cst_13 = arith.constant 0.000000e+00 : f32
    %17 = vector.broadcast %cst_13 : f32 to vector<256x32xf32>
    %18 = arith.maximumf %16, %17 : vector<256x32xf32>
    %19 = arith.truncf %18 : vector<256x32xf32> to vector<256x32xbf16>
    %cst_14 = arith.constant dense<0.000000e+00> : vector<256x32xf32>
    %20 = tpu.matmul %19, %8, %cst_14 {dimension_numbers = #tpu.dot_dimension_numbers<[1], [0], [0], [1], [0, 0, 1, 1], [], []>} : vector<256x32xbf16>, vector<32x32xbf16>, vector<256x32xf32> -> vector<256x32xf32>
    %21 = arith.truncf %20 : vector<256x32xf32> to vector<256x32xbf16>
    %cst_15 = arith.constant dense<0.000000e+00> : vector<256x32xf32>
    %22 = tpu.matmul %2, %21, %cst_15 {dimension_numbers = #tpu.dot_dimension_numbers<[1], [0], [0], [1], [0, 0, 1, 1], [], []>} : vector<256x256xbf16>, vector<256x32xbf16>, vector<256x32xf32> -> vector<256x32xf32>
    %c0_16 = arith.constant 0 : index
    %c0_17 = arith.constant 0 : index
    %23 = vector.load %arg6[%c0_16, %c0_17] : memref<1x32xf32, #tpu.memory_space<vmem>>, vector<1x32xf32>
    %24 = vector.broadcast %23 : vector<1x32xf32> to vector<256x32xf32>
    %25 = arith.addf %22, %24 : vector<256x32xf32>
    %cst_18 = arith.constant 0.000000e+00 : f32
    %26 = vector.broadcast %cst_18 : f32 to vector<256x32xf32>
    %27 = arith.maximumf %25, %26 : vector<256x32xf32>
    %28 = tpu.iota {dimensions = array<i32: 0>} : vector<16x256xi32>
    %29 = tpu.iota {dimensions = array<i32: 1>} : vector<16x256xi32>
    %c16_i32 = arith.constant 16 : i32
    %30 = vector.broadcast %c16_i32 : i32 to vector<16x256xi32>
    %31 = arith.muli %28, %30 : vector<16x256xi32>
    %32 = arith.cmpi sge, %29, %31 : vector<16x256xi32>
    %c16_i32_19 = arith.constant 16 : i32
    %33 = vector.broadcast %c16_i32_19 : i32 to vector<16x256xi32>
    %34 = arith.addi %31, %33 : vector<16x256xi32>
    %35 = arith.cmpi slt, %29, %34 : vector<16x256xi32>
    %36 = arith.andi %32, %35 : vector<16x256xi1>
    %cst_20 = arith.constant 1.000000e+00 : f32
    %cst_21 = arith.constant 0.000000e+00 : f32
    %37 = vector.broadcast %cst_20 : f32 to vector<16x256xf32>
    %38 = vector.broadcast %cst_21 : f32 to vector<16x256xf32>
    %39 = arith.select %36, %37, %38 : vector<16x256xi1>, vector<16x256xf32>
    %40 = arith.truncf %39 : vector<16x256xf32> to vector<16x256xbf16>
    %41 = arith.truncf %27 : vector<256x32xf32> to vector<256x32xbf16>
    %cst_22 = arith.constant dense<0.000000e+00> : vector<16x32xf32>
    %42 = tpu.matmul %40, %41, %cst_22 {dimension_numbers = #tpu.dot_dimension_numbers<[1], [0], [0], [1], [0, 0, 1, 1], [], []>} : vector<16x256xbf16>, vector<256x32xbf16>, vector<16x32xf32> -> vector<16x32xf32>
    %cst_23 = arith.constant 6.250000e-02 : f32
    %43 = vector.broadcast %cst_23 : f32 to vector<16x32xf32>
    %44 = arith.mulf %42, %43 : vector<16x32xf32>
    %45 = arith.truncf %44 : vector<16x32xf32> to vector<16x32xbf16>
    %cst_24 = arith.constant dense<0.000000e+00> : vector<16x4xf32>
    %46 = tpu.matmul %45, %10, %cst_24 {dimension_numbers = #tpu.dot_dimension_numbers<[1], [0], [0], [1], [0, 0, 1, 1], [], []>} : vector<16x32xbf16>, vector<32x4xbf16>, vector<16x4xf32> -> vector<16x4xf32>
    %c0_25 = arith.constant 0 : index
    %c0_26 = arith.constant 0 : index
    %47 = vector.load %arg8[%c0_25, %c0_26] : memref<1x4xf32, #tpu.memory_space<vmem>>, vector<1x4xf32>
    %48 = vector.broadcast %47 : vector<1x4xf32> to vector<16x4xf32>
    %49 = arith.addf %46, %48 : vector<16x4xf32>
    %c0_27 = arith.constant 0 : index
    %c0_28 = arith.constant 0 : index
    %50 = vector.load %arg9[%c0_27, %c0_28] : memref<16x4xf32, #tpu.memory_space<vmem>>, vector<16x4xf32>
    tpu.vector_store %arg9[%c0_27, %c0_28], %49 {strides = array<i32>} : memref<16x4xf32, #tpu.memory_space<vmem>>, vector<16x4xf32>,
    return
  }
  func.func @transform_0(%arg0: i32) -> (i32, i32, i32) {
    %c0_i32 = arith.constant 0 : i32
    %c0_i32_0 = arith.constant 0 : i32
    %c0_i32_1 = arith.constant 0 : i32
    return %arg0, %c0_i32, %c0_i32_0 : i32, i32, i32
  }
  func.func @transform_1(%arg0: i32) -> (i32, i32) {
    %c0_i32 = arith.constant 0 : i32
    %c0_i32_0 = arith.constant 0 : i32
    return %arg0, %c0_i32 : i32, i32
  }
  func.func @transform_2(%arg0: i32) -> (i32, i32) {
    %c0_i32 = arith.constant 0 : i32
    %c0_i32_0 = arith.constant 0 : i32
    %c0_i32_1 = arith.constant 0 : i32
    return %c0_i32, %c0_i32_0 : i32, i32
  }
  func.func @transform_3(%arg0: i32) -> (i32, i32) {
    %c0_i32 = arith.constant 0 : i32
    %c0_i32_0 = arith.constant 0 : i32
    %c0_i32_1 = arith.constant 0 : i32
    return %c0_i32, %c0_i32_0 : i32, i32
  }
  func.func @transform_4(%arg0: i32) -> (i32, i32) {
    %c0_i32 = arith.constant 0 : i32
    %c0_i32_0 = arith.constant 0 : i32
    %c0_i32_1 = arith.constant 0 : i32
    return %c0_i32, %c0_i32_0 : i32, i32
  }
  func.func @transform_5(%arg0: i32) -> (i32, i32) {
    %c0_i32 = arith.constant 0 : i32
    %c0_i32_0 = arith.constant 0 : i32
    %c0_i32_1 = arith.constant 0 : i32
    return %c0_i32, %c0_i32_0 : i32, i32
  }
  func.func @transform_6(%arg0: i32) -> (i32, i32) {
    %c0_i32 = arith.constant 0 : i32
    %c0_i32_0 = arith.constant 0 : i32
    %c0_i32_1 = arith.constant 0 : i32
    return %c0_i32, %c0_i32_0 : i32, i32
  }
  func.func @transform_7(%arg0: i32) -> (i32, i32) {
    %c0_i32 = arith.constant 0 : i32
    %c0_i32_0 = arith.constant 0 : i32
    %c0_i32_1 = arith.constant 0 : i32
    return %c0_i32, %c0_i32_0 : i32, i32
  }
  func.func @transform_8(%arg0: i32) -> (i32, i32) {
    %c0_i32 = arith.constant 0 : i32
    %c0_i32_0 = arith.constant 0 : i32
    return %arg0, %c0_i32 : i32, i32
  }
}

</mosaic_0001>

<bundles_post_ra>
// kernel: classifier_forward.1
= control target key start
LH: loop header
LB: loop body
LE: loop exit
PB: predicated region body
PF: predicated region fallthrough
CT: control target
= control target key end

     0   :  { %s2052_s27 = smov 0   ;;  %s2491_s0 = inlined_call_operand.vmem [shape: f32[2,256,256], index: 0, kind: input, shape index: {}]   ;;  %s2492_s1 = inlined_call_operand.vmem [shape: f32[512,16], index: 1, kind: input, shape index: {}]   ;;  %s2493_s2 = inlined_call_operand.vmem [shape: f32[16,32], index: 2, kind: input, shape index: {}]   ;;  %s2494_s3 = inlined_call_operand.vmem [shape: f32[1,32], index: 3, kind: input, shape index: {}]   ;;  %s2495_s4 = inlined_call_operand.vmem [shape: f32[32,32], index: 4, kind: input, shape index: {}]   ;;  %s2496_s5 = inlined_call_operand.vmem [shape: f32[1,32], index: 5, kind: input, shape index: {}]   ;;  %s2497_s6 = inlined_call_operand.vmem [shape: f32[32,4], index: 6, kind: input, shape index: {}]   ;;  %s2498_s7 = inlined_call_operand.vmem [shape: f32[1,4], index: 7, kind: input, shape index: {}]   ;;  %s2499_s8 = inlined_call_operand.vmem [shape: f32[32,4], index: 8, kind: output, shape index: {}]  }
   0x1 LB: > { %s2058_s28 = sadd.s32 4294967295, %s2002_s27   ;;  %p1571_p0 = scmp.ge.s32.totalorder %s2002_s27, 1  ;;  %s2002_s27 = sphi %s2052_s27, %s18_s27  }
   0x2   : > { %p273_p1 = scmp.lt.s32.totalorder %s2002_s27, 3 }
   0x4   : > { %p274_p2 = pnand %p1571_p0, %p273_p1 }
   0x5   : > { %s1574_s29 = sshll.u32 (!%p274_p2), %s2058_s28, 5  ;;  %p312_p3 = scmp.lt.s32.totalorder (!%p274_p2), %s2058_s28, 1  ;;  %v474_v56 = vld [vmem:[%s2493_s2] sm:$0xff] (!%p274_p2)  ;;  %v475_v57 = vld [vmem:[%s2493_s2 + $0x8] sm:$0xff] (!%p274_p2)  ;;  %vm673_vm0 = vcmask (!%p274_p2), 130048   ;;  %vm931_vm1 = vcmask (!%p274_p2), 261120  }
   0x6   : > { %277 = sbr.rel (%p274_p2) target bundleno = 1624 (0x658), region = 52  ;;  %p318_p4 = scmp.lt.s32.totalorder (!%p274_p2), %s1574_s29, 63  ;;  %v476_v59 = vpack.c.bf16 (!%p274_p2), %v475_v57, %v474_v56 }
   0x7   : > { %s1576_s21 = sshll.u32 (!%p274_p2), %s2058_s28, 1 }
   0x8   : > { %1983 = vmatprep.subr.bf16.mxu1 (!%p274_p2), %v476_v59  ;;  %p324_p5 = scmp.lt.s32.totalorder (!%p274_p2), %s1576_s21, 3 }
   0x9   : > { %1984 = vmatpush3.bf16.msra.mxu1 (!%p274_p2), %v476_v59 }
   0xd   : > { %s313_s30 = scalar_select %p312_p3, %s2058_s28, 1 }
   0xe   : > { %s2505_s29 = smov (!%p318_p4, %s1574_s29), 63  ;;  %s2507_s21 = smov (!%p324_p5, %s1576_s21), 3 }
   0xf   : > { %s1620_s9 = sshll.u32 %s313_s30, 9  ;;  %s1575_s10 = sshll.u32 %s2505_s29, 3 }
  0x10   : > { %s2068_s13 = scalar_lea.vmem %s2491_s0, %s1620_s9  ;;  %s2073_s16 = scalar_lea.vmem %s2492_s1, %s1575_s10 }
  0x11   : > { %v331_v0 = vld [vmem:[%s2068_s13 + $0x8] sm:$0xff]  ;;  %v333_v1 = vld [vmem:[%s2068_s13 + $0x18] sm:$0xff]  ;;  %v442_v2 = vld [vmem:[%s2073_s16 + $0x80] sm:$0xff]  ;;  %s1577_s22 = sshll.u32 %s2507_s21, 3 }
  0x12   : > { %v443_v3 = vld [vmem:[%s2073_s16 + $0x88] sm:$0xff]  ;;  %v426_v4 = vld [vmem:[%s2073_s16] sm:$0xff]  ;;  %v2080_v5 = vpack.c.bf16 %v333_v1, %v331_v0  ;;  %v444_v8 = vld [vmem:[%s2073_s16 + $0x90] sm:$0xff]  ;;  %s327_s29 = scalar_lea.vmem %s2499_s8, %s1577_s22 }
  0x13   : > { %v466_v6 = vpack.c.bf16 %v443_v3, %v442_v2  ;;  %v427_v7 = vld [vmem:[%s2073_s16 + $0x8] sm:$0xff]  ;;  %v445_v9 = vld [vmem:[%s2073_s16 + $0x98] sm:$0xff]  ;;  %v428_v12 = vld [vmem:[%s2073_s16 + $0x10] sm:$0xff] }
  0x14   : > { %v458_v10 = vpack.c.bf16 %v427_v7, %v426_v4  ;;  %v467_v11 = vpack.c.bf16 %v445_v9, %v444_v8  ;;  %v429_v13 = vld [vmem:[%s2073_s16 + $0x18] sm:$0xff]  ;;  %v446_v14 = vld [vmem:[%s2073_s16 + $0xa0] sm:$0xff]  ;;  %521 = vmatprep.mubr.bf16.mxu0 %v2080_v5  ;;  %v447_v15 = vld [vmem:[%s2073_s16 + $0xa8] sm:$0xff] }
  0x15   : > { %1621 = vmatprep.subr.bf16.mxu0 %v466_v6  ;;  %v459_v16 = vpack.c.bf16 %v429_v13, %v428_v12  ;;  %v468_v17 = vpack.c.bf16 %v447_v15, %v446_v14  ;;  %v430_v18 = vld [vmem:[%s2073_s16 + $0x20] sm:$0xff]  ;;  %v431_v19 = vld [vmem:[%s2073_s16 + $0x28] sm:$0xff]  ;;  %v448_v20 = vld [vmem:[%s2073_s16 + $0xb0] sm:$0xff] }
  0x16   : > { %1622 = vmatpush3.bf16.msra.mxu0 %v458_v10  ;;  %v449_v21 = vld [vmem:[%s2073_s16 + $0xb8] sm:$0xff]  ;;  %v460_v22 = vpack.c.bf16 %v431_v19, %v430_v18  ;;  %v432_v24 = vld [vmem:[%s2073_s16 + $0x30] sm:$0xff]  ;;  %v450_v26 = vld [vmem:[%s2073_s16 + $0xc0] sm:$0xff] }
  0x17   : > { %1623 = vmatprep.subr.bf16.mxu0 %v467_v11  ;;  %v469_v23 = vpack.c.bf16 %v449_v21, %v448_v20  ;;  %v433_v25 = vld [vmem:[%s2073_s16 + $0x38] sm:$0xff]  ;;  %v451_v27 = vld [vmem:[%s2073_s16 + $0xc8] sm:$0xff]  ;;  %v434_v30 = vld [vmem:[%s2073_s16 + $0x40] sm:$0xff] }
  0x18   : > { %v461_v28 = vpack.c.bf16 %v433_v25, %v432_v24  ;;  %v470_v29 = vpack.c.bf16 %v451_v27, %v450_v26  ;;  %v435_v31 = vld [vmem:[%s2073_s16 + $0x48] sm:$0xff]  ;;  %v452_v32 = vld [vmem:[%s2073_s16 + $0xd0] sm:$0xff]  ;;  %v453_v33 = vld [vmem:[%s2073_s16 + $0xd8] sm:$0xff] }
  0x19   : > { %v462_v34 = vpack.c.bf16 %v435_v31, %v434_v30  ;;  %v471_v35 = vpack.c.bf16 %v453_v33, %v452_v32  ;;  %v436_v36 = vld [vmem:[%s2073_s16 + $0x50] sm:$0xff]  ;;  %v437_v37 = vld [vmem:[%s2073_s16 + $0x58] sm:$0xff]  ;;  %v454_v38 = vld [vmem:[%s2073_s16 + $0xe0] sm:$0xff] }
  0x1a   : > { %1624 = vmatpush3.bf16.msra.mxu0 %v459_v16  ;;  %v455_v39 = vld [vmem:[%s2073_s16 + $0xe8] sm:$0xff]  ;;  %v463_v40 = vpack.c.bf16 %v437_v37, %v436_v36  ;;  %v438_v42 = vld [vmem:[%s2073_s16 + $0x60] sm:$0xff]  ;;  %v456_v44 = vld [vmem:[%s2073_s16 + $0xf0] sm:$0xff] }
  0x1b   : > { %1625 = vmatprep.subr.bf16.mxu0 %v468_v17  ;;  %v472_v41 = vpack.c.bf16 %v455_v39, %v454_v38  ;;  %v439_v43 = vld [vmem:[%s2073_s16 + $0x68] sm:$0xff]  ;;  %v457_v45 = vld [vmem:[%s2073_s16 + $0xf8] sm:$0xff]  ;;  %v440_v48 = vld [vmem:[%s2073_s16 + $0x70] sm:$0xff] }
  0x1c   : > { %v464_v46 = vpack.c.bf16 %v439_v43, %v438_v42  ;;  %v473_v47 = vpack.c.bf16 %v457_v45, %v456_v44  ;;  %v441_v49 = vld [vmem:[%s2073_s16 + $0x78] sm:$0xff]  ;;  %v330_v51 = vld [vmem:[%s2068_s13] sm:$0xff]  ;;  %v332_v52 = vld [vmem:[%s2068_s13 + $0x10] sm:$0xff] }
  0x1d   : > { %v465_v50 = vpack.c.bf16 %v441_v49, %v440_v48  ;;  %v335_v53 = vld [vmem:[%s2068_s13 + $0x28] sm:$0xff]  ;;  %v337_v54 = vld [vmem:[%s2068_s13 + $0x38] sm:$0xff]  ;;  %v2116_v55 = vpack.c.bf16 %v332_v52, %v330_v51  ;;  %v334_v60 = vld [vmem:[%s2068_s13 + $0x20] sm:$0xff] }
  0x1e   : > { %1626 = vmatpush3.bf16.msra.mxu0 %v460_v22  ;;  %v2124_v58 = vpack.c.bf16 %v337_v54, %v335_v53  ;;  %v336_v61 = vld [vmem:[%s2068_s13 + $0x30] sm:$0xff]  ;;  %v339_v62 = vld [vmem:[%s2068_s13 + $0x48] sm:$0xff]  ;;  %v341_v63 = vld [vmem:[%s2068_s13 + $0x58] sm:$0xff] }
  0x1f   : > { %1627 = vmatprep.subr.bf16.mxu0 %v469_v23  ;;  %v2132_v0 = vpack.c.bf16 %v336_v61, %v334_v60  ;;  %v2134_v1 = vpack.c.bf16 %v341_v63, %v339_v62  ;;  %v338_v2 = vld [vmem:[%s2068_s13 + $0x40] sm:$0xff]  ;;  %v340_v3 = vld [vmem:[%s2068_s13 + $0x50] sm:$0xff]  ;;  %v343_v4 = vld [vmem:[%s2068_s13 + $0x68] sm:$0xff] }
  0x20   : > { %v345_v6 = vld [vmem:[%s2068_s13 + $0x78] sm:$0xff]  ;;  %v2142_v7 = vpack.c.bf16 %v340_v3, %v338_v2  ;;  %v342_v9 = vld [vmem:[%s2068_s13 + $0x60] sm:$0xff]  ;;  %v344_v10 = vld [vmem:[%s2068_s13 + $0x70] sm:$0xff] }
  0x21   : > { %v2144_v8 = vpack.c.bf16 %v345_v6, %v343_v4  ;;  %v347_v11 = vld [vmem:[%s2068_s13 + $0x88] sm:$0xff]  ;;  %v349_v12 = vld [vmem:[%s2068_s13 + $0x98] sm:$0xff]  ;;  %v2152_v13 = vpack.c.bf16 %v344_v10, %v342_v9  ;;  %v346_v15 = vld [vmem:[%s2068_s13 + $0x80] sm:$0xff] }
  0x22   : > { %1628 = vmatpush3.bf16.msra.mxu0 %v461_v28  ;;  %v2154_v14 = vpack.c.bf16 %v349_v12, %v347_v11  ;;  %v348_v16 = vld [vmem:[%s2068_s13 + $0x90] sm:$0xff]  ;;  %v351_v17 = vld [vmem:[%s2068_s13 + $0xa8] sm:$0xff]  ;;  %v353_v18 = vld [vmem:[%s2068_s13 + $0xb8] sm:$0xff] }
  0x23   : > { %1629 = vmatprep.subr.bf16.mxu0 %v470_v29  ;;  %v2162_v19 = vpack.c.bf16 %v348_v16, %v346_v15  ;;  %v2164_v20 = vpack.c.bf16 %v353_v18, %v351_v17  ;;  %v350_v21 = vld [vmem:[%s2068_s13 + $0xa0] sm:$0xff]  ;;  %v352_v22 = vld [vmem:[%s2068_s13 + $0xb0] sm:$0xff]  ;;  %v355_v23 = vld [vmem:[%s2068_s13 + $0xc8] sm:$0xff] }
  0x24   : > { %v357_v24 = vld [vmem:[%s2068_s13 + $0xd8] sm:$0xff]  ;;  %v2172_v25 = vpack.c.bf16 %v352_v22, %v350_v21  ;;  %v354_v27 = vld [vmem:[%s2068_s13 + $0xc0] sm:$0xff]  ;;  %v356_v28 = vld [vmem:[%s2068_s13 + $0xd0] sm:$0xff] }
  0x25   : > { %v2174_v26 = vpack.c.bf16 %v357_v24, %v355_v23  ;;  %v359_v29 = vld [vmem:[%s2068_s13 + $0xe8] sm:$0xff]  ;;  %v361_v30 = vld [vmem:[%s2068_s13 + $0xf8] sm:$0xff]  ;;  %v2182_v31 = vpack.c.bf16 %v356_v28, %v354_v27  ;;  %v358_v33 = vld [vmem:[%s2068_s13 + $0xe0] sm:$0xff] }
  0x26   : > { %1630 = vmatpush3.bf16.msra.mxu0 %v462_v34  ;;  %v2184_v32 = vpack.c.bf16 %v361_v30, %v359_v29  ;;  %v360_v34 = vld [vmem:[%s2068_s13 + $0xf0] sm:$0xff]  ;;  %v365_v36 = vld [vmem:[%s2068_s13 + $0x118] sm:$0xff]  ;;  %v362_v39 = vld [vmem:[%s2068_s13 + $0x100] sm:$0xff] }
  0x27   : > { %1631 = vmatprep.subr.bf16.mxu0 %v471_v35  ;;  %v363_v35 = vld [vmem:[%s2068_s13 + $0x108] sm:$0xff]  ;;  %v2192_v37 = vpack.c.bf16 %v360_v34, %v358_v33  ;;  %v369_v42 = vld [vmem:[%s2068_s13 + $0x138] sm:$0xff]  ;;  %v366_v45 = vld [vmem:[%s2068_s13 + $0x120] sm:$0xff] }
  0x28   : > { %v2194_v38 = vpack.c.bf16 %v365_v36, %v363_v35  ;;  %v373_v48 = vld [vmem:[%s2068_s13 + $0x158] sm:$0xff]  ;;  %v370_v51 = vld [vmem:[%s2068_s13 + $0x140] sm:$0xff]  ;;  %v372_v52 = vld [vmem:[%s2068_s13 + $0x150] sm:$0xff] }
  0x29   : > { %v375_v53 = vld [vmem:[%s2068_s13 + $0x168] sm:$0xff]  ;;  %v377_v54 = vld [vmem:[%s2068_s13 + $0x178] sm:$0xff]  ;;  %v2222_v56 = vpack.c.bf16 %v372_v52, %v370_v51  ;;  %v376_v60 = vld [vmem:[%s2068_s13 + $0x170] sm:$0xff] }
  0x2a   : > { %1632 = vmatpush3.bf16.msra.mxu0 %v463_v40  ;;  %v364_v40 = vld [vmem:[%s2068_s13 + $0x110] sm:$0xff]  ;;  %v2224_v57 = vpack.c.bf16 %v377_v54, %v375_v53  ;;  %v379_v61 = vld [vmem:[%s2068_s13 + $0x188] sm:$0xff]  ;;  %v381_v62 = vld [vmem:[%s2068_s13 + $0x198] sm:$0xff] }
  0x2b   : > { %1633 = vmatprep.subr.bf16.mxu0 %v472_v41  ;;  %v367_v41 = vld [vmem:[%s2068_s13 + $0x128] sm:$0xff]  ;;  %v2202_v43 = vpack.c.bf16 %v364_v40, %v362_v39  ;;  %v2234_v2 = vpack.c.bf16 %v381_v62, %v379_v61  ;;  %v378_v3 = vld [vmem:[%s2068_s13 + $0x180] sm:$0xff]  ;;  %v380_v4 = vld [vmem:[%s2068_s13 + $0x190] sm:$0xff] }
  0x2c   : > { %v2204_v44 = vpack.c.bf16 %v369_v42, %v367_v41  ;;  %v383_v6 = vld [vmem:[%s2068_s13 + $0x1a8] sm:$0xff]  ;;  %v385_v9 = vld [vmem:[%s2068_s13 + $0x1b8] sm:$0xff]  ;;  %v2242_v10 = vpack.c.bf16 %v380_v4, %v378_v3  ;;  %v382_v12 = vld [vmem:[%s2068_s13 + $0x1a0] sm:$0xff] }
  0x2d   : > { %v2244_v11 = vpack.c.bf16 %v385_v9, %v383_v6  ;;  %v384_v15 = vld [vmem:[%s2068_s13 + $0x1b0] sm:$0xff]  ;;  %v387_v16 = vld [vmem:[%s2068_s13 + $0x1c8] sm:$0xff]  ;;  %v389_v17 = vld [vmem:[%s2068_s13 + $0x1d8] sm:$0xff] }
  0x2e   : > { %1634 = vmatpush3.bf16.msra.mxu0 %v464_v46  ;;  %v368_v46 = vld [vmem:[%s2068_s13 + $0x130] sm:$0xff]  ;;  %v2252_v18 = vpack.c.bf16 %v384_v15, %v382_v12  ;;  %v2254_v21 = vpack.c.bf16 %v389_v17, %v387_v16  ;;  %v386_v22 = vld [vmem:[%s2068_s13 + $0x1c0] sm:$0xff]  ;;  %v391_v24 = vld [vmem:[%s2068_s13 + $0x1e8] sm:$0xff] }
  0x2f   : > { %1635 = vmatprep.subr.bf16.mxu0 %v473_v47  ;;  %v371_v47 = vld [vmem:[%s2068_s13 + $0x148] sm:$0xff]  ;;  %v2212_v49 = vpack.c.bf16 %v368_v46, %v366_v45  ;;  %v388_v23 = vld [vmem:[%s2068_s13 + $0x1d0] sm:$0xff]  ;;  %v393_v27 = vld [vmem:[%s2068_s13 + $0x1f8] sm:$0xff] }
  0x30   : > { %v2262_v28 = vpack.c.bf16 %v388_v23, %v386_v22  ;;  %v2264_v29 = vpack.c.bf16 %v393_v27, %v391_v24  ;;  %v390_v30 = vld [vmem:[%s2068_s13 + $0x1e0] sm:$0xff]  ;;  %v392_v33 = vld [vmem:[%s2068_s13 + $0x1f0] sm:$0xff] }
  0x31   : > { %v2270_v34 = vpack.c.bf16 %v392_v33, %v390_v30 }
  0x32   : > { %1636 = vmatpush3.bf16.msra.mxu0 %v465_v50  ;;  %v2214_v50 = vpack.c.bf16 %v373_v48, %v371_v47 }
  0x33   : > { %1905 = vmatprep.subr.bf16.mxu0 %v476_v59 }
  0x35   : > { %522 = vmatmul.mubr.bf16.vlgmr.msra.gmra.mrb[0].mxu0 %v2116_v55 }
  0x36   : > { %529 = vmatprep.mubr.bf16.mxu0 %v2124_v58  ;;  %1906 = vmatpush3.bf16.msra.mxu0 %v476_v59  ;;  %v374_v59 = vld [vmem:[%s2068_s13 + $0x160] sm:$0xff] }
  0x37   : > { %v2232_v63 = vpack.c.bf16 %v376_v60, %v374_v59 }
  0x3d   : > { %530 = vmatmul.mubr.bf16.gmra.mrb[4].mxu0 %v2132_v0 }
  0x3e   : > { %537 = vmatprep.mubr.bf16.mxu0 %v2134_v1 }
  0x45   : > { %538 = vmatmul.mubr.bf16.gmra.mrb[8].mxu0 %v2142_v7 }
  0x46   : > { %545 = vmatprep.mubr.bf16.mxu0 %v2144_v8 }
  0x4d   : > { %546 = vmatmul.mubr.bf16.gmra.mrb[12].mxu0 %v2152_v13 }
  0x4e   : > { %553 = vmatprep.mubr.bf16.mxu0 %v2154_v14 }
  0x55   : > { %554 = vmatmul.mubr.bf16.gmra.mrb[16].mxu0 %v2162_v19 }
  0x56   : > { %561 = vmatprep.mubr.bf16.mxu0 %v2164_v20 }
  0x5d   : > { %562 = vmatmul.mubr.bf16.gmra.mrb[20].mxu0 %v2172_v25 }
  0x5e   : > { %569 = vmatprep.mubr.bf16.mxu0 %v2174_v26 }
  0x65   : > { %570 = vmatmul.mubr.bf16.gmra.mrb[24].mxu0 %v2182_v31 }
  0x66   : > { %577 = vmatprep.mubr.bf16.mxu0 %v2184_v32 }
  0x6d   : > { %578 = vmatmul.mubr.bf16.gmra.mrb[28].mxu0 %v2192_v37 }
  0x6e   : > { %585 = vmatprep.mubr.bf16.mxu0 %v2194_v38 }
  0x75   : > { %586 = vmatmul.mubr.bf16.gmra.mrb[32].mxu0 %v2202_v43 }
  0x76   : > { %593 = vmatprep.mubr.bf16.mxu0 %v2204_v44 }
  0x7d   : > { %594 = vmatmul.mubr.bf16.gmra.mrb[36].mxu0 %v2212_v49 }
  0x7e   : > { %601 = vmatprep.mubr.bf16.mxu0 %v2214_v50 }
  0x85   : > { %602 = vmatmul.mubr.bf16.gmra.mrb[40].mxu0 %v2222_v56 }
  0x86   : > { %609 = vmatprep.mubr.bf16.mxu0 %v2224_v57 }
  0x8d   : > { %610 = vmatmul.mubr.bf16.gmra.mrb[44].mxu0 %v2232_v63 }
  0x8e   : > { %617 = vmatprep.mubr.bf16.mxu0 %v2234_v2 }
  0x95   : > { %618 = vmatmul.mubr.bf16.gmra.mrb[48].mxu0 %v2242_v10 }
  0x96   : > { %625 = vmatprep.mubr.bf16.mxu0 %v2244_v11 }
  0x9d   : > { %626 = vmatmul.mubr.bf16.gmra.mrb[52].mxu0 %v2252_v18 }
  0x9e   : > { %633 = vmatprep.mubr.bf16.mxu0 %v2254_v21 }
  0xa5   : > { %634 = vmatmul.mubr.bf16.gmra.mrb[56].mxu0 %v2262_v28 }
  0xa6   : > { %641 = vmatprep.mubr.bf16.mxu0 %v2264_v29 }
  0xad   : > { %642 = vmatmul.mubr.bf16.gmra.mrb[60].mxu0 %v2270_v34 }
 0x108   : > { %v1637_v35 = vpop.f32.mrb[0].mxu0 }
 0x109   : > { %v1638_v36 = vpop.f32.mrb[1].mxu0 }
 0x10a   : > { %v1639_v39 = vadd.f32 %v1638_v36, %v1637_v35  ;;  %v1640_v40 = vpop.f32.mrb[2].mxu0 }
 0x10b   : > { %v1641_v41 = vpop.f32.mrb[3].mxu0 }
 0x10c   : > { %v1642_v42 = vadd.f32 %v1641_v41, %v1640_v40 }
 0x10e   : > { %v650_v45 = vpack.c.bf16 %v1642_v42, %v1639_v39 }
 0x110   : > { %v1643_v46 = vpop.f32.mrb[4].mxu0  ;;  %1907 = vmatprep.mubr.msk.bf16.mxu0 %vm673_vm0, %v650_v45 }
 0x111   : > { %v1644_v47 = vpop.f32.mrb[5].mxu0 }
 0x112   : > { %v1645_v48 = vadd.f32 %v1644_v47, %v1643_v46  ;;  %v1646_v51 = vpop.f32.mrb[6].mxu0 }
 0x113   : > { %v1647_v52 = vpop.f32.mrb[7].mxu0 }
 0x114   : > { %v1648_v53 = vadd.f32 %v1647_v52, %v1646_v51 }
 0x116   : > { %v651_v54 = vpack.c.bf16 %v1648_v53, %v1645_v48 }
 0x118   : > { %v1649_v59 = vpop.f32.mrb[8].mxu0  ;;  %1908 = vmatmul.mubr.msk.bf16.vlgmr.msra.gmra.mrb[64].mxu0 %vm673_vm0, %v651_v54 }
 0x119   : > { %v1650_v60 = vpop.f32.mrb[9].mxu0 }
 0x11a   : > { %v1651_v61 = vadd.f32 %v1650_v60, %v1649_v59  ;;  %v1652_v62 = vpop.f32.mrb[10].mxu0 }
 0x11b   : > { %v1653_v3 = vpop.f32.mrb[11].mxu0 }
 0x11c   : > { %v1654_v4 = vadd.f32 %v1653_v3, %v1652_v62 }
 0x11e   : > { %v652_v6 = vpack.c.bf16 %v1654_v4, %v1651_v61 }
 0x120   : > { %v1655_v9 = vpop.f32.mrb[12].mxu0  ;;  %1911 = vmatprep.mubr.msk.bf16.mxu0 %vm673_vm0, %v652_v6 }
 0x121   : > { %v1656_v12 = vpop.f32.mrb[13].mxu0 }
 0x122   : > { %v1657_v15 = vadd.f32 %v1656_v12, %v1655_v9  ;;  %v1658_v16 = vpop.f32.mrb[14].mxu0 }
 0x123   : > { %v1659_v17 = vpop.f32.mrb[15].mxu0 }
 0x124   : > { %v1660_v22 = vadd.f32 %v1659_v17, %v1658_v16 }
 0x126   : > { %v653_v23 = vpack.c.bf16 %v1660_v22, %v1657_v15 }
 0x128   : > { %v1661_v24 = vpop.f32.mrb[16].mxu0  ;;  %1912 = vmatmul.mubr.msk.bf16.gmra.mrb[68].mxu0 %vm673_vm0, %v653_v23 }
 0x129   : > { %v1662_v27 = vpop.f32.mrb[17].mxu0 }
 0x12a   : > { %v1663_v30 = vadd.f32 %v1662_v27, %v1661_v24  ;;  %v1664_v33 = vpop.f32.mrb[18].mxu0 }
 0x12b   : > { %v1665_v35 = vpop.f32.mrb[19].mxu0 }
 0x12c   : > { %v1666_v36 = vadd.f32 %v1665_v35, %v1664_v33 }
 0x12e   : > { %v654_v39 = vpack.c.bf16 %v1666_v36, %v1663_v30 }
 0x130   : > { %v1667_v40 = vpop.f32.mrb[20].mxu0  ;;  %1915 = vmatprep.mubr.msk.bf16.mxu0 %vm673_vm0, %v654_v39 }
 0x131   : > { %v1668_v41 = vpop.f32.mrb[21].mxu0 }
 0x132   : > { %v1669_v42 = vadd.f32 %v1668_v41, %v1667_v40  ;;  %v1670_v45 = vpop.f32.mrb[22].mxu0 }
 0x133   : > { %v1671_v46 = vpop.f32.mrb[23].mxu0 }
 0x134   : > { %v1672_v47 = vadd.f32 %v1671_v46, %v1670_v45 }
 0x136   : > { %v655_v48 = vpack.c.bf16 %v1672_v47, %v1669_v42 }
 0x138   : > { %v1673_v51 = vpop.f32.mrb[24].mxu0  ;;  %1916 = vmatmul.mubr.msk.bf16.gmra.mrb[72].mxu0 %vm673_vm0, %v655_v48 }
 0x139   : > { %v1674_v52 = vpop.f32.mrb[25].mxu0 }
 0x13a   : > { %v1675_v53 = vadd.f32 %v1674_v52, %v1673_v51  ;;  %v1676_v54 = vpop.f32.mrb[26].mxu0 }
 0x13b   : > { %v1677_v59 = vpop.f32.mrb[27].mxu0 }
 0x13c   : > { %v1678_v60 = vadd.f32 %v1677_v59, %v1676_v54 }
 0x13e   : > { %v656_v61 = vpack.c.bf16 %v1678_v60, %v1675_v53 }
 0x140   : > { %v1679_v62 = vpop.f32.mrb[28].mxu0  ;;  %1919 = vmatprep.mubr.msk.bf16.mxu0 %vm673_vm0, %v656_v61 }
 0x141   : > { %v1680_v3 = vpop.f32.mrb[29].mxu0 }
 0x142   : > { %v1681_v4 = vadd.f32 %v1680_v3, %v1679_v62  ;;  %v1682_v6 = vpop.f32.mrb[30].mxu0 }
 0x143   : > { %v1683_v9 = vpop.f32.mrb[31].mxu0 }
 0x144   : > { %v1684_v12 = vadd.f32 %v1683_v9, %v1682_v6 }
 0x146   : > { %v657_v15 = vpack.c.bf16 %v1684_v12, %v1681_v4 }
 0x148   : > { %v1685_v16 = vpop.f32.mrb[32].mxu0  ;;  %1920 = vmatmul.mubr.msk.bf16.gmra.mrb[76].mxu0 %vm673_vm0, %v657_v15 }
 0x149   : > { %v1686_v17 = vpop.f32.mrb[33].mxu0 }
 0x14a   : > { %v1687_v22 = vadd.f32 %v1686_v17, %v1685_v16  ;;  %v1688_v23 = vpop.f32.mrb[34].mxu0  ;;  %v477_v17 = vld [vmem:[%s2495_s4] sm:$0xff] }
 0x14b   : > { %v1689_v24 = vpop.f32.mrb[35].mxu0 }
 0x14c   : > { %v1690_v27 = vadd.f32 %v1689_v24, %v1688_v23 }
 0x14e   : > { %v658_v30 = vpack.c.bf16 %v1690_v27, %v1687_v22  ;;  %v478_v22 = vld [vmem:[%s2495_s4 + $0x8] sm:$0xff] }
 0x14f   : > { %v481_v24 = vpack.c.bf16 %v478_v22, %v477_v17 }
 0x150   : > { %v1691_v33 = vpop.f32.mrb[36].mxu0  ;;  %1923 = vmatprep.mubr.msk.bf16.mxu0 %vm673_vm0, %v658_v30  ;;  %v479_v30 = vld [vmem:[%s2495_s4 + $0x10] sm:$0xff] }
 0x151   : > { %v1692_v35 = vpop.f32.mrb[37].mxu0  ;;  %1939 = vmatprep.subr.bf16.mxu1 %v481_v24 }
 0x152   : > { %v1693_v36 = vadd.f32 %v1692_v35, %v1691_v33  ;;  %v1694_v39 = vpop.f32.mrb[38].mxu0  ;;  %v480_v33 = vld [vmem:[%s2495_s4 + $0x18] sm:$0xff] }
 0x153   : > { %v1695_v40 = vpop.f32.mrb[39].mxu0 }
 0x154   : > { %v1696_v41 = vadd.f32 %v1695_v40, %v1694_v39 }
 0x156   : > { %v659_v42 = vpack.c.bf16 %v1696_v41, %v1693_v36  ;;  %v482_v36 = vpack.c.bf16 %v480_v33, %v479_v30 }
 0x158   : > { %v1697_v45 = vpop.f32.mrb[40].mxu0  ;;  %1924 = vmatmul.mubr.msk.bf16.gmra.mrb[80].mxu0 %vm673_vm0, %v659_v42 }
 0x159   : > { %v1698_v46 = vpop.f32.mrb[41].mxu0 }
 0x15a   : > { %v1699_v47 = vadd.f32 %v1698_v46, %v1697_v45  ;;  %v1700_v48 = vpop.f32.mrb[42].mxu0 }
 0x15b   : > { %v1701_v51 = vpop.f32.mrb[43].mxu0 }
 0x15c   : > { %v1702_v52 = vadd.f32 %v1701_v51, %v1700_v48 }
 0x15e   : > { %v660_v53 = vpack.c.bf16 %v1702_v52, %v1699_v47 }
 0x160   : > { %v1703_v54 = vpop.f32.mrb[44].mxu0  ;;  %1927 = vmatprep.mubr.msk.bf16.mxu1 %vm673_vm0, %v660_v53 }
 0x161   : > { %v1704_v59 = vpop.f32.mrb[45].mxu0 }
 0x162   : > { %v1705_v60 = vadd.f32 %v1704_v59, %v1703_v54  ;;  %v1706_v61 = vpop.f32.mrb[46].mxu0 }
 0x163   : > { %v1707_v62 = vpop.f32.mrb[47].mxu0 }
 0x164   : > { %v1708_v3 = vadd.f32 %v1707_v62, %v1706_v61 }
 0x166   : > { %v661_v4 = vpack.c.bf16 %v1708_v3, %v1705_v60 }
 0x168   : > { %v1709_v6 = vpop.f32.mrb[48].mxu0  ;;  %1928 = vmatmul.mubr.msk.bf16.vlgmr.msra.gmra.mrb[0].mxu1 %vm673_vm0, %v661_v4 }
 0x169   : > { %v1710_v9 = vpop.f32.mrb[49].mxu0  ;;  %1940 = vmatpush3.bf16.msra.mxu1 %v481_v24 }
 0x16a   : > { %v1711_v12 = vadd.f32 %v1710_v9, %v1709_v6  ;;  %v1712_v15 = vpop.f32.mrb[50].mxu0  ;;  %1941 = vmatprep.subr.bf16.mxu1 %v482_v36 }
 0x16b   : > { %v1713_v16 = vpop.f32.mrb[51].mxu0 }
 0x16c   : > { %v1714_v23 = vadd.f32 %v1713_v16, %v1712_v15 }
 0x16d   : > { %1942 = vmatpush3.bf16.msra.mxu1 %v482_v36 }
 0x16e   : > { %v662_v27 = vpack.c.bf16 %v1714_v23, %v1711_v12  ;;  %v2304_v12 = vld [vmem:[%s2494_s3] ss:$0 sm:$0xff] }
 0x170   : > { %v1715_v35 = vpop.f32.mrb[52].mxu0  ;;  %1931 = vmatprep.mubr.msk.bf16.mxu1 %vm673_vm0, %v662_v27 }
 0x171   : > { %v1716_v39 = vpop.f32.mrb[53].mxu0 }
 0x172   : > { %v1717_v40 = vadd.f32 %v1716_v39, %v1715_v35  ;;  %v1718_v41 = vpop.f32.mrb[54].mxu0 }
 0x173   : > { %v1719_v42 = vpop.f32.mrb[55].mxu0 }
 0x174   : > { %v1720_v45 = vadd.f32 %v1719_v42, %v1718_v41 }
 0x176   : > { %v663_v46 = vpack.c.bf16 %v1720_v45, %v1717_v40 }
 0x178   : > { %v1721_v47 = vpop.f32.mrb[56].mxu0  ;;  %1932 = vmatmul.mubr.msk.bf16.gmra.mrb[4].mxu1 %vm673_vm0, %v663_v46 }
 0x179   : > { %v1722_v48 = vpop.f32.mrb[57].mxu0 }
 0x17a   : > { %v1723_v51 = vadd.f32 %v1722_v48, %v1721_v47  ;;  %v1724_v52 = vpop.f32.mrb[58].mxu0 }
 0x17b   : > { %v1725_v53 = vpop.f32.mrb[59].mxu0 }
 0x17c   : > { %v1726_v54 = vadd.f32 %v1725_v53, %v1724_v52 }
 0x17e   : > { %v664_v59 = vpack.c.bf16 %v1726_v54, %v1723_v51 }
 0x180   : > { %v1727_v60 = vpop.f32.mrb[60].mxu0  ;;  %1935 = vmatprep.mubr.msk.bf16.mxu1 %vm673_vm0, %v664_v59 }
 0x181   : > { %v1728_v61 = vpop.f32.mrb[61].mxu0 }
 0x182   : > { %v1729_v62 = vadd.f32 %v1728_v61, %v1727_v60  ;;  %v1730_v3 = vpop.f32.mrb[62].mxu0 }
 0x183   : > { %v1731_v4 = vpop.f32.mrb[63].mxu0 }
 0x184   : > { %v1732_v6 = vadd.f32 %v1731_v4, %v1730_v3 }
 0x186   : > { %v665_v9 = vpack.c.bf16 %v1732_v6, %v1729_v62 }
 0x188   : > { %1936 = vmatmul.mubr.msk.bf16.gmra.mrb[8].mxu1 %vm673_vm0, %v665_v9  ;;  %vm2006_vm0 = vmmov 0  }
 0x1eb   : > { %v1909_v15 = vpop.f32.mrb[64].mxu0 }
 0x1ec   : > { %v765_v16 = vadd.f32 %v1909_v15, %v2304_v12  ;;  %v756_v17 = vpop.f32.mrb[65].mxu0 }
 0x1ed   : > { %v757_v22 = vadd.f32 %v2304_v12, %v756_v17  ;;  %v1910_v23 = vpop.f32.mrb[66].mxu0 }
 0x1ee   : > { %v768_v24 = vadd.f32 %v1910_v23, %v2304_v12  ;;  %v759_v27 = vpop.f32.mrb[67].mxu0  ;;  %v885_v33 = vmax.f32 %v765_v16, 0.0 }
 0x1ef   : > { %v760_v30 = vadd.f32 %v2304_v12, %v759_v27  ;;  %v883_v36 = vmax.f32 %v757_v22, 0.0 }
 0x1f0   : > { %v886_v35 = vmax.f32 %v768_v24, 0.0 }
 0x1f1   : > { %v884_v39 = vmax.f32 %v760_v30, 0.0 }
 0x1f2   : > { %v916_v40 = vpack.c.bf16 %v886_v35, %v885_v33 }
 0x1f3   : > { %v915_v41 = vpack.c.bf16 %v884_v39, %v883_v36 }
 0x1f5   : > { %1943 = vmatprep.mubr.msk.bf16.mxu1 %vm931_vm1, %v915_v41 }
 0x1f6   : > { %1944 = vmatmul.mubr.msk.bf16.vlgmr.msra.gmra.mrb[12].mxu1 %vm931_vm1, %v916_v40 }
 0x1fb   : > { %v1913_v42 = vpop.f32.mrb[68].mxu0 }
 0x1fc   : > { %v781_v45 = vadd.f32 %v1913_v42, %v2304_v12  ;;  %v772_v46 = vpop.f32.mrb[69].mxu0 }
 0x1fd   : > { %v773_v47 = vadd.f32 %v2304_v12, %v772_v46  ;;  %v1914_v48 = vpop.f32.mrb[70].mxu0 }
 0x1fe   : > { %v784_v51 = vadd.f32 %v1914_v48, %v2304_v12  ;;  %v775_v52 = vpop.f32.mrb[71].mxu0  ;;  %v889_v54 = vmax.f32 %v781_v45, 0.0 }
 0x1ff   : > { %v776_v53 = vadd.f32 %v2304_v12, %v775_v52  ;;  %v887_v60 = vmax.f32 %v773_v47, 0.0 }
 0x200   : > { %v890_v59 = vmax.f32 %v784_v51, 0.0 }
 0x201   : > { %v888_v61 = vmax.f32 %v776_v53, 0.0 }
 0x202   : > { %v918_v62 = vpack.c.bf16 %v890_v59, %v889_v54 }
 0x203   : > { %v917_v3 = vpack.c.bf16 %v888_v61, %v887_v60 }
 0x205   : > { %1947 = vmatprep.mubr.msk.bf16.mxu1 %vm931_vm1, %v917_v3 }
 0x206   : > { %1948 = vmatmul.mubr.msk.bf16.gmra.mrb[16].mxu1 %vm931_vm1, %v918_v62 }
 0x20b   : > { %v1917_v4 = vpop.f32.mrb[72].mxu0 }
 0x20c   : > { %v797_v6 = vadd.f32 %v1917_v4, %v2304_v12  ;;  %v788_v9 = vpop.f32.mrb[73].mxu0 }
 0x20d   : > { %v789_v15 = vadd.f32 %v2304_v12, %v788_v9  ;;  %v1918_v16 = vpop.f32.mrb[74].mxu0 }
 0x20e   : > { %v800_v17 = vadd.f32 %v1918_v16, %v2304_v12  ;;  %v791_v22 = vpop.f32.mrb[75].mxu0  ;;  %v893_v24 = vmax.f32 %v797_v6, 0.0 }
 0x20f   : > { %v792_v23 = vadd.f32 %v2304_v12, %v791_v22  ;;  %v891_v30 = vmax.f32 %v789_v15, 0.0 }
 0x210   : > { %v894_v27 = vmax.f32 %v800_v17, 0.0 }
 0x211   : > { %v892_v33 = vmax.f32 %v792_v23, 0.0 }
 0x212   : > { %v920_v35 = vpack.c.bf16 %v894_v27, %v893_v24 }
 0x213   : > { %v919_v36 = vpack.c.bf16 %v892_v33, %v891_v30 }
 0x215   : > { %1951 = vmatprep.mubr.msk.bf16.mxu1 %vm931_vm1, %v919_v36 }
 0x216   : > { %1952 = vmatmul.mubr.msk.bf16.gmra.mrb[20].mxu1 %vm931_vm1, %v920_v35 }
 0x21b   : > { %v1921_v39 = vpop.f32.mrb[76].mxu0 }
 0x21c   : > { %v813_v40 = vadd.f32 %v1921_v39, %v2304_v12  ;;  %v804_v41 = vpop.f32.mrb[77].mxu0 }
 0x21d   : > { %v805_v42 = vadd.f32 %v2304_v12, %v804_v41  ;;  %v1922_v45 = vpop.f32.mrb[78].mxu0 }
 0x21e   : > { %v816_v46 = vadd.f32 %v1922_v45, %v2304_v12  ;;  %v807_v47 = vpop.f32.mrb[79].mxu0  ;;  %v897_v51 = vmax.f32 %v813_v40, 0.0 }
 0x21f   : > { %v808_v48 = vadd.f32 %v2304_v12, %v807_v47  ;;  %v895_v53 = vmax.f32 %v805_v42, 0.0 }
 0x220   : > { %v898_v52 = vmax.f32 %v816_v46, 0.0 }
 0x221   : > { %v896_v54 = vmax.f32 %v808_v48, 0.0 }
 0x222   : > { %v922_v59 = vpack.c.bf16 %v898_v52, %v897_v51 }
 0x223   : > { %v921_v60 = vpack.c.bf16 %v896_v54, %v895_v53 }
 0x225   : > { %1955 = vmatprep.mubr.msk.bf16.mxu1 %vm931_vm1, %v921_v60 }
 0x226   : > { %1956 = vmatmul.mubr.msk.bf16.gmra.mrb[24].mxu1 %vm931_vm1, %v922_v59 }
 0x22b   : > { %v1925_v61 = vpop.f32.mrb[80].mxu0 }
 0x22c   : > { %v829_v62 = vadd.f32 %v1925_v61, %v2304_v12  ;;  %v820_v3 = vpop.f32.mrb[81].mxu0 }
 0x22d   : > { %v821_v4 = vadd.f32 %v2304_v12, %v820_v3  ;;  %v1926_v6 = vpop.f32.mrb[82].mxu0 }
 0x22e   : > { %v832_v9 = vadd.f32 %v1926_v6, %v2304_v12  ;;  %v823_v15 = vpop.f32.mrb[83].mxu0  ;;  %v901_v17 = vmax.f32 %v829_v62, 0.0 }
 0x22f   : > { %v824_v16 = vadd.f32 %v2304_v12, %v823_v15  ;;  %v899_v23 = vmax.f32 %v821_v4, 0.0 }
 0x230   : > { %v902_v22 = vmax.f32 %v832_v9, 0.0 }
 0x231   : > { %v900_v24 = vmax.f32 %v824_v16, 0.0 }
 0x232   : > { %v924_v27 = vpack.c.bf16 %v902_v22, %v901_v17 }
 0x233   : > { %v923_v30 = vpack.c.bf16 %v900_v24, %v899_v23 }
 0x235   : > { %1959 = vmatprep.mubr.msk.bf16.mxu1 %vm931_vm1, %v923_v30 }
 0x236   : > { %1960 = vmatmul.mubr.msk.bf16.gmra.mrb[28].mxu1 %vm931_vm1, %v924_v27 }
 0x23b   : > { %v1929_v33 = vpop.f32.mrb[0].mxu1 }
 0x23c   : > { %v845_v35 = vadd.f32 %v1929_v33, %v2304_v12  ;;  %v836_v36 = vpop.f32.mrb[1].mxu1 }
 0x23d   : > { %v837_v39 = vadd.f32 %v2304_v12, %v836_v36  ;;  %v1930_v40 = vpop.f32.mrb[2].mxu1 }
 0x23e   : > { %v848_v41 = vadd.f32 %v1930_v40, %v2304_v12  ;;  %v839_v42 = vpop.f32.mrb[3].mxu1  ;;  %v905_v46 = vmax.f32 %v845_v35, 0.0 }
 0x23f   : > { %v840_v45 = vadd.f32 %v2304_v12, %v839_v42  ;;  %v903_v48 = vmax.f32 %v837_v39, 0.0 }
 0x240   : > { %v906_v47 = vmax.f32 %v848_v41, 0.0 }
 0x241   : > { %v904_v51 = vmax.f32 %v840_v45, 0.0 }
 0x242   : > { %v926_v52 = vpack.c.bf16 %v906_v47, %v905_v46 }
 0x243   : > { %v925_v53 = vpack.c.bf16 %v904_v51, %v903_v48 }
 0x245   : > { %1963 = vmatprep.mubr.msk.bf16.mxu1 %vm931_vm1, %v925_v53 }
 0x246   : > { %1964 = vmatmul.mubr.msk.bf16.gmra.mrb[32].mxu1 %vm931_vm1, %v926_v52 }
 0x24b   : > { %v1933_v54 = vpop.f32.mrb[4].mxu1 }
 0x24c   : > { %v861_v59 = vadd.f32 %v1933_v54, %v2304_v12  ;;  %v852_v60 = vpop.f32.mrb[5].mxu1 }
 0x24d   : > { %v853_v61 = vadd.f32 %v2304_v12, %v852_v60  ;;  %v1934_v62 = vpop.f32.mrb[6].mxu1 }
 0x24e   : > { %v864_v3 = vadd.f32 %v1934_v62, %v2304_v12  ;;  %v855_v4 = vpop.f32.mrb[7].mxu1  ;;  %v909_v9 = vmax.f32 %v861_v59, 0.0 }
 0x24f   : > { %v856_v6 = vadd.f32 %v2304_v12, %v855_v4  ;;  %v907_v16 = vmax.f32 %v853_v61, 0.0 }
 0x250   : > { %v910_v15 = vmax.f32 %v864_v3, 0.0 }
 0x251   : > { %v908_v17 = vmax.f32 %v856_v6, 0.0 }
 0x252   : > { %v928_v22 = vpack.c.bf16 %v910_v15, %v909_v9 }
 0x253   : > { %v927_v23 = vpack.c.bf16 %v908_v17, %v907_v16 }
 0x255   : > { %1967 = vmatprep.mubr.msk.bf16.mxu1 %vm931_vm1, %v927_v23 }
 0x256   : > { %1968 = vmatmul.mubr.msk.bf16.gmra.mrb[36].mxu1 %vm931_vm1, %v928_v22 }
 0x25b   : > { %v1937_v24 = vpop.f32.mrb[8].mxu1 }
 0x25c   : > { %v877_v27 = vadd.f32 %v1937_v24, %v2304_v12  ;;  %v868_v30 = vpop.f32.mrb[9].mxu1 }
 0x25d   : > { %v869_v33 = vadd.f32 %v2304_v12, %v868_v30  ;;  %v1938_v35 = vpop.f32.mrb[10].mxu1 }
 0x25e   : > { %v880_v36 = vadd.f32 %v1938_v35, %v2304_v12  ;;  %v871_v39 = vpop.f32.mrb[11].mxu1  ;;  %v913_v41 = vmax.f32 %v877_v27, 0.0 }
 0x25f   : > { %v872_v40 = vadd.f32 %v2304_v12, %v871_v39  ;;  %v911_v45 = vmax.f32 %v869_v33, 0.0 }
 0x260   : > { %v914_v42 = vmax.f32 %v880_v36, 0.0 }
 0x261   : > { %v912_v46 = vmax.f32 %v872_v40, 0.0 }
 0x262   : > { %v930_v47 = vpack.c.bf16 %v914_v42, %v913_v41 }
 0x263   : > { %v929_v48 = vpack.c.bf16 %v912_v46, %v911_v45 }
 0x265   : > { %1971 = vmatprep.mubr.msk.bf16.mxu1 %vm931_vm1, %v929_v48 }
 0x266   : > { %1972 = vmatmul.mubr.msk.bf16.gmra.mrb[40].mxu1 %vm931_vm1, %v930_v47 }
 0x267   : > { %1196 = vmatprep.mubr.bf16.mxu1 %v2080_v5 }
 0x2c9   : > { %v1945_v51 = vpop.f32.mrb[12].mxu1 }
 0x2ca   : > { %v1014_v52 = vpop.f32.mrb[13].mxu1 }
 0x2cb   : > { %v1946_v53 = vpop.f32.mrb[14].mxu1 }
 0x2cc   : > { %v1142_v54 = vpack.c.bf16 %v1946_v53, %v1945_v51  ;;  %v1017_v59 = vpop.f32.mrb[15].mxu1 }
 0x2cd   : > { %v1141_v60 = vpack.c.bf16 %v1017_v59, %v1014_v52 }
 0x2d9   : > { %v1949_v61 = vpop.f32.mrb[16].mxu1 }
 0x2da   : > { %v1030_v12 = vpop.f32.mrb[17].mxu1 }
 0x2db   : > { %v1950_v62 = vpop.f32.mrb[18].mxu1 }
 0x2dc   : > { %v1144_v3 = vpack.c.bf16 %v1950_v62, %v1949_v61  ;;  %v1033_v4 = vpop.f32.mrb[19].mxu1 }
 0x2dd   : > { %v1143_v6 = vpack.c.bf16 %v1033_v4, %v1030_v12 }
 0x2e9   : > { %v1953_v9 = vpop.f32.mrb[20].mxu1 }
 0x2ea   : > { %v1046_v15 = vpop.f32.mrb[21].mxu1 }
 0x2eb   : > { %v1954_v16 = vpop.f32.mrb[22].mxu1 }
 0x2ec   : > { %v1146_v17 = vpack.c.bf16 %v1954_v16, %v1953_v9  ;;  %v1049_v22 = vpop.f32.mrb[23].mxu1 }
 0x2ed   : > { %v1145_v23 = vpack.c.bf16 %v1049_v22, %v1046_v15 }
 0x2f9   : > { %v1957_v24 = vpop.f32.mrb[24].mxu1 }
 0x2fa   : > { %v1062_v5 = vpop.f32.mrb[25].mxu1 }
 0x2fb   : > { %v1958_v27 = vpop.f32.mrb[26].mxu1 }
 0x2fc   : > { %v1148_v30 = vpack.c.bf16 %v1958_v27, %v1957_v24  ;;  %v1065_v33 = vpop.f32.mrb[27].mxu1 }
 0x2fd   : > { %v1147_v35 = vpack.c.bf16 %v1065_v33, %v1062_v5 }
 0x309   : > { %v1961_v36 = vpop.f32.mrb[28].mxu1 }
 0x30a   : > { %v1078_v39 = vpop.f32.mrb[29].mxu1 }
 0x30b   : > { %v1962_v40 = vpop.f32.mrb[30].mxu1 }
 0x30c   : > { %v1150_v41 = vpack.c.bf16 %v1962_v40, %v1961_v36  ;;  %v1081_v42 = vpop.f32.mrb[31].mxu1 }
 0x30d   : > { %v1149_v45 = vpack.c.bf16 %v1081_v42, %v1078_v39 }
 0x30f   : > { %1768 = vmatprep.subr.bf16.mxu1 %v1149_v45 }
 0x310   : > { %1769 = vmatpush3.bf16.msra.mxu1 %v1141_v60 }
 0x311   : > { %1770 = vmatprep.subr.bf16.mxu1 %v1150_v41 }
 0x314   : > { %1771 = vmatpush3.bf16.msra.mxu1 %v1142_v54 }
 0x319   : > { %v1965_v46 = vpop.f32.mrb[32].mxu1 }
 0x31a   : > { %v1094_v47 = vpop.f32.mrb[33].mxu1 }
 0x31b   : > { %v1966_v48 = vpop.f32.mrb[34].mxu1 }
 0x31c   : > { %v1152_v51 = vpack.c.bf16 %v1966_v48, %v1965_v46  ;;  %v1097_v52 = vpop.f32.mrb[35].mxu1 }
 0x31d   : > { %v1151_v53 = vpack.c.bf16 %v1097_v52, %v1094_v47 }
 0x31f   : > { %1772 = vmatprep.subr.bf16.mxu1 %v1151_v53 }
 0x320   : > { %1773 = vmatpush3.bf16.msra.mxu1 %v1143_v6 }
 0x321   : > { %1774 = vmatprep.subr.bf16.mxu1 %v1152_v51 }
 0x324   : > { %1775 = vmatpush3.bf16.msra.mxu1 %v1144_v3 }
 0x329   : > { %v1969_v59 = vpop.f32.mrb[36].mxu1 }
 0x32a   : > { %v1110_v61 = vpop.f32.mrb[37].mxu1 }
 0x32b   : > { %v1970_v12 = vpop.f32.mrb[38].mxu1 }
 0x32c   : > { %v1154_v62 = vpack.c.bf16 %v1970_v12, %v1969_v59  ;;  %v1113_v4 = vpop.f32.mrb[39].mxu1 }
 0x32d   : > { %v1153_v9 = vpack.c.bf16 %v1113_v4, %v1110_v61 }
 0x32f   : > { %1776 = vmatprep.subr.bf16.mxu1 %v1153_v9 }
 0x330   : > { %1777 = vmatpush3.bf16.msra.mxu1 %v1145_v23 }
 0x331   : > { %1778 = vmatprep.subr.bf16.mxu1 %v1154_v62 }
 0x334   : > { %1779 = vmatpush3.bf16.msra.mxu1 %v1146_v17 }
 0x339   : > { %v1973_v54 = vpop.f32.mrb[40].mxu1 }
 0x33a   : > { %v1126_v60 = vpop.f32.mrb[41].mxu1 }
 0x33b   : > { %v1974_v15 = vpop.f32.mrb[42].mxu1 }
 0x33c   : > { %v1156_v16 = vpack.c.bf16 %v1974_v15, %v1973_v54  ;;  %v1129_v22 = vpop.f32.mrb[43].mxu1 }
 0x33d   : > { %v1155_v24 = vpack.c.bf16 %v1129_v22, %v1126_v60 }
 0x33f   : > { %1780 = vmatprep.subr.bf16.mxu1 %v1155_v24 }
 0x340   : > { %1781 = vmatpush3.bf16.msra.mxu1 %v1147_v35 }
 0x341   : > { %1782 = vmatprep.subr.bf16.mxu1 %v1156_v16 }
 0x344   : > { %1783 = vmatpush3.bf16.msra.mxu1 %v1148_v30 }
 0x347   : > { %1197 = vmatmul.mubr.bf16.vlgmr.msra.gmra.mrb[44].mxu1 %v2116_v55  ;;  %v1357_v55 = vlaneseq }
 0x348   : > { %1204 = vmatprep.mubr.bf16.mxu1 %v2124_v58 }
 0x349   : > { %v1358_v58 = vshrl.u32 %v1357_v55, 7 }
 0x34f   : > { %1205 = vmatmul.mubr.bf16.gmra.mrb[48].mxu1 %v2132_v0  ;;  %v1359_v0 = vadd.s32 8, %v1358_v58 }
 0x350   : > { %1212 = vmatprep.mubr.bf16.mxu1 %v2134_v1 }
 0x357   : > { %1213 = vmatmul.mubr.bf16.gmra.mrb[52].mxu1 %v2142_v7  ;;  %v1361_v7 = vand.u32 127, %v1357_v55 }
 0x358   : > { %1220 = vmatprep.mubr.bf16.mxu1 %v2144_v8  ;;  %v1363_v8 = vmul.u32 16, %v1358_v58 }
 0x35a   : > { %vm1365_vm9 = vcmp.ge.s32.totalorder %v1361_v7, %v1363_v8 }
 0x35f   : > { %1221 = vmatmul.mubr.bf16.gmra.mrb[56].mxu1 %v2152_v13  ;;  %v1364_v13 = vmul.u32 16, %v1359_v0 }
 0x360   : > { %1228 = vmatprep.mubr.bf16.mxu1 %v2154_v14  ;;  %v2389_v14 = vld [vmem:[%s2496_s5] ss:$0 sm:$0xff] }
 0x361   : > { %vm1367_vm11 = vcmp.ge.s32.totalorder %v1361_v7, %v1364_v13 }
 0x367   : > { %1229 = vmatmul.mubr.bf16.gmra.mrb[60].mxu1 %v2162_v19 }
 0x368   : > { %1236 = vmatprep.mubr.bf16.mxu1 %v2164_v20 }
 0x36f   : > { %1237 = vmatmul.mubr.bf16.gmra.mrb[64].mxu1 %v2172_v25 }
 0x370   : > { %1244 = vmatprep.mubr.bf16.mxu1 %v2174_v26  ;;  %v1362_v26 = vadd.s32 128, %v1361_v7 }
 0x372   : > { %vm1366_vm2 = vcmp.ge.s32.totalorder %v1362_v26, %v1363_v8  ;;  %vm1368_vm3 = vcmp.ge.s32.totalorder %v1362_v26, %v1364_v13 }
 0x377   : > { %1245 = vmatmul.mubr.bf16.gmra.mrb[68].mxu1 %v2182_v31  ;;  %v1369_v31 = vadd.s32 16, %v1363_v8 }
 0x378   : > { %1252 = vmatprep.mubr.bf16.mxu1 %v2184_v32  ;;  %v1370_v32 = vadd.s32 16, %v1364_v13 }
 0x379   : > { %vm1371_vm4 = vcmp.lt.s32.totalorder %v1361_v7, %v1369_v31  ;;  %vm1372_vm5 = vcmp.lt.s32.totalorder %v1362_v26, %v1369_v31 }
 0x37a   : > { %vm1373_vm6 = vcmp.lt.s32.totalorder %v1361_v7, %v1370_v32  ;;  %vm1374_vm7 = vcmp.lt.s32.totalorder %v1362_v26, %v1370_v32  ;;  %vm1376_vm8 = vmand %vm1366_vm2, %vm1372_vm5  ;;  %vm1496_vm2 = vcmask 31744  }
 0x37b   : > { %vm1378_vm10 = vmand %vm1368_vm3, %vm1374_vm7 }
 0x37c   : > { %vm1612_vm12 = vmpackc.low %vm1378_vm10, %vm1376_vm8 }
 0x37d   : > { %vm2395_vm13 = vmand %vm1365_vm9, %vm1371_vm4 }
 0x37e   : > { %vm2402_vm14 = vmand %vm1367_vm11, %vm1373_vm6 }
 0x37f   : > { %1253 = vmatmul.mubr.bf16.gmra.mrb[72].mxu1 %v2192_v37  ;;  %vm1614_vm15 = vmpackc.low %vm2402_vm14, %vm2395_vm13 }
 0x380   : > { %1260 = vmatprep.mubr.bf16.mxu1 %v2194_v38 }
 0x387   : > { %1261 = vmatmul.mubr.bf16.gmra.mrb[76].mxu1 %v2202_v43 }
 0x388   : > { %1268 = vmatprep.mubr.bf16.mxu1 %v2204_v44 }
 0x38f   : > { %1269 = vmatmul.mubr.bf16.gmra.mrb[80].mxu1 %v2212_v49 }
 0x390   : > { %1276 = vmatprep.mubr.bf16.mxu1 %v2214_v50 }
 0x397   : > { %1277 = vmatmul.mubr.bf16.gmra.mrb[84].mxu1 %v2222_v56 }
 0x398   : > { %1284 = vmatprep.mubr.bf16.mxu1 %v2224_v57 }
 0x39f   : > { %1285 = vmatmul.mubr.bf16.gmra.mrb[88].mxu1 %v2232_v63  ;;  %v2004_v63 = vmov 1.0|1.0  }
 0x3a0   : > { %1292 = vmatprep.mubr.bf16.mxu1 %v2234_v2  ;;  %1613 = vmatprep.mubr.msk.bf16.mxu0 %vm1612_vm12, %v2004_v63 }
 0x3a7   : > { %1293 = vmatmul.mubr.bf16.gmra.mrb[92].mxu1 %v2242_v10 }
 0x3a8   : > { %1300 = vmatprep.mubr.bf16.mxu1 %v2244_v11 }
 0x3af   : > { %1301 = vmatmul.mubr.bf16.gmra.mrb[96].mxu1 %v2252_v18 }
 0x3b0   : > { %1308 = vmatprep.mubr.bf16.mxu1 %v2254_v21  ;;  %v485_v21 = vld [vmem:[%s2497_s6 + $0x10] sm:$0xff] }
 0x3b7   : > { %1309 = vmatmul.mubr.bf16.gmra.mrb[100].mxu1 %v2262_v28 }
 0x3b8   : > { %1316 = vmatprep.mubr.bf16.mxu1 %v2264_v29 }
 0x3bf   : > { %1317 = vmatmul.mubr.bf16.gmra.mrb[104].mxu1 %v2270_v34 }
 0x41a   : > { %v1784_v1 = vpop.f32.mrb[44].mxu1 }
 0x41b   : > { %v1785_v19 = vpop.f32.mrb[45].mxu1 }
 0x41c   : > { %v1786_v20 = vadd.f32 %v1785_v19, %v1784_v1  ;;  %v1787_v25 = vpop.f32.mrb[46].mxu1 }
 0x41d   : > { %v1788_v37 = vpop.f32.mrb[47].mxu1 }
 0x41e   : > { %v1199_v38 = vadd.f32 %v1786_v20, %v2389_v14  ;;  %v1789_v43 = vadd.f32 %v1788_v37, %v1787_v25 }
 0x420   : > { %v1202_v44 = vadd.f32 %v1789_v43, %v2389_v14  ;;  %v1325_v49 = vmax.f32 %v1199_v38, 0.0 }
 0x422   : > { %v1326_v50 = vmax.f32 %v1202_v44, 0.0  ;;  %v1790_v56 = vpop.f32.mrb[48].mxu1 }
 0x423   : > { %v1791_v57 = vpop.f32.mrb[49].mxu1 }
 0x424   : > { %v2399_v10 = vpack.c.bf16 %v1326_v50, %v1325_v49  ;;  %v1792_v11 = vadd.f32 %v1791_v57, %v1790_v56  ;;  %v1793_v18 = vpop.f32.mrb[50].mxu1 }
 0x425   : > { %v1794_v28 = vpop.f32.mrb[51].mxu1 }
 0x426   : > { %v1207_v29 = vadd.f32 %v1792_v11, %v2389_v14  ;;  %v1795_v34 = vadd.f32 %v1794_v28, %v1793_v18 }
 0x428   : > { %v1210_v3 = vadd.f32 %v1795_v34, %v2389_v14  ;;  %v1327_v6 = vmax.f32 %v1207_v29, 0.0 }
 0x42a   : > { %v1328_v17 = vmax.f32 %v1210_v3, 0.0  ;;  %v1796_v23 = vpop.f32.mrb[52].mxu1 }
 0x42b   : > { %v1797_v5 = vpop.f32.mrb[53].mxu1 }
 0x42c   : > { %v2412_v27 = vpack.c.bf16 %v1328_v17, %v1327_v6  ;;  %v1798_v30 = vadd.f32 %v1797_v5, %v1796_v23  ;;  %v1799_v33 = vpop.f32.mrb[54].mxu1 }
 0x42d   : > { %v1800_v35 = vpop.f32.mrb[55].mxu1 }
 0x42e   : > { %v1215_v36 = vadd.f32 %v1798_v30, %v2389_v14  ;;  %v1801_v39 = vadd.f32 %v1800_v35, %v1799_v33 }
 0x430   : > { %v1218_v40 = vadd.f32 %v1801_v39, %v2389_v14  ;;  %v1329_v41 = vmax.f32 %v1215_v36, 0.0 }
 0x432   : > { %v1330_v42 = vmax.f32 %v1218_v40, 0.0  ;;  %v1802_v45 = vpop.f32.mrb[56].mxu1 }
 0x433   : > { %v1803_v46 = vpop.f32.mrb[57].mxu1 }
 0x434   : > { %v2416_v47 = vpack.c.bf16 %v1330_v42, %v1329_v41  ;;  %v1804_v48 = vadd.f32 %v1803_v46, %v1802_v45  ;;  %v1805_v51 = vpop.f32.mrb[58].mxu1 }
 0x435   : > { %v1806_v52 = vpop.f32.mrb[59].mxu1 }
 0x436   : > { %v1223_v53 = vadd.f32 %v1804_v48, %v2389_v14  ;;  %v1807_v59 = vadd.f32 %v1806_v52, %v1805_v51 }
 0x438   : > { %v1226_v61 = vadd.f32 %v1807_v59, %v2389_v14  ;;  %v1331_v12 = vmax.f32 %v1223_v53, 0.0 }
 0x43a   : > { %v1332_v62 = vmax.f32 %v1226_v61, 0.0  ;;  %v1808_v4 = vpop.f32.mrb[60].mxu1 }
 0x43b   : > { %v1809_v9 = vpop.f32.mrb[61].mxu1 }
 0x43c   : > { %v2420_v54 = vpack.c.bf16 %v1332_v62, %v1331_v12  ;;  %v1810_v60 = vadd.f32 %v1809_v9, %v1808_v4  ;;  %v1811_v15 = vpop.f32.mrb[62].mxu1 }
 0x43d   : > { %v1812_v16 = vpop.f32.mrb[63].mxu1 }
 0x43e   : > { %v1231_v22 = vadd.f32 %v1810_v60, %v2389_v14  ;;  %v1813_v24 = vadd.f32 %v1812_v16, %v1811_v15 }
 0x440   : > { %v1234_v55 = vadd.f32 %v1813_v24, %v2389_v14  ;;  %v1333_v58 = vmax.f32 %v1231_v22, 0.0 }
 0x442   : > { %v1334_v0 = vmax.f32 %v1234_v55, 0.0  ;;  %v1814_v1 = vpop.f32.mrb[64].mxu1 }
 0x443   : > { %v1815_v7 = vpop.f32.mrb[65].mxu1 }
 0x444   : > { %v2424_v8 = vpack.c.bf16 %v1334_v0, %v1333_v58  ;;  %v1816_v13 = vadd.f32 %v1815_v7, %v1814_v1  ;;  %v1817_v19 = vpop.f32.mrb[66].mxu1 }
 0x445   : > { %v1818_v20 = vpop.f32.mrb[67].mxu1 }
 0x446   : > { %v1239_v25 = vadd.f32 %v1816_v13, %v2389_v14  ;;  %v1819_v26 = vadd.f32 %v1818_v20, %v1817_v19 }
 0x448   : > { %v1242_v31 = vadd.f32 %v1819_v26, %v2389_v14  ;;  %v1335_v32 = vmax.f32 %v1239_v25, 0.0 }
 0x44a   : > { %v1336_v37 = vmax.f32 %v1242_v31, 0.0  ;;  %v1820_v38 = vpop.f32.mrb[68].mxu1 }
 0x44b   : > { %v1821_v43 = vpop.f32.mrb[69].mxu1 }
 0x44c   : > { %v2428_v44 = vpack.c.bf16 %v1336_v37, %v1335_v32  ;;  %v1822_v49 = vadd.f32 %v1821_v43, %v1820_v38  ;;  %v1823_v50 = vpop.f32.mrb[70].mxu1 }
 0x44d   : > { %v1824_v56 = vpop.f32.mrb[71].mxu1 }
 0x44e   : > { %v1247_v57 = vadd.f32 %v1822_v49, %v2389_v14  ;;  %v1825_v11 = vadd.f32 %v1824_v56, %v1823_v50 }
 0x450   : > { %v1250_v18 = vadd.f32 %v1825_v11, %v2389_v14  ;;  %v1337_v28 = vmax.f32 %v1247_v57, 0.0 }
 0x452   : > { %v1338_v29 = vmax.f32 %v1250_v18, 0.0  ;;  %v1826_v34 = vpop.f32.mrb[72].mxu1 }
 0x453   : > { %v1827_v3 = vpop.f32.mrb[73].mxu1 }
 0x454   : > { %v2432_v6 = vpack.c.bf16 %v1338_v29, %v1337_v28  ;;  %v1828_v17 = vadd.f32 %v1827_v3, %v1826_v34  ;;  %v1829_v23 = vpop.f32.mrb[74].mxu1 }
 0x455   : > { %v1830_v5 = vpop.f32.mrb[75].mxu1 }
 0x456   : > { %v1255_v30 = vadd.f32 %v1828_v17, %v2389_v14  ;;  %v1831_v33 = vadd.f32 %v1830_v5, %v1829_v23 }
 0x458   : > { %v1258_v35 = vadd.f32 %v1831_v33, %v2389_v14  ;;  %v1339_v36 = vmax.f32 %v1255_v30, 0.0 }
 0x45a   : > { %v1340_v39 = vmax.f32 %v1258_v35, 0.0  ;;  %v1832_v40 = vpop.f32.mrb[76].mxu1 }
 0x45b   : > { %v1833_v41 = vpop.f32.mrb[77].mxu1 }
 0x45c   : > { %v2436_v42 = vpack.c.bf16 %v1340_v39, %v1339_v36  ;;  %v1834_v45 = vadd.f32 %v1833_v41, %v1832_v40  ;;  %v1835_v46 = vpop.f32.mrb[78].mxu1 }
 0x45d   : > { %v1836_v48 = vpop.f32.mrb[79].mxu1 }
 0x45e   : > { %v1263_v51 = vadd.f32 %v1834_v45, %v2389_v14  ;;  %v1837_v52 = vadd.f32 %v1836_v48, %v1835_v46 }
 0x460   : > { %v1266_v53 = vadd.f32 %v1837_v52, %v2389_v14  ;;  %v1341_v59 = vmax.f32 %v1263_v51, 0.0 }
 0x462   : > { %v1342_v61 = vmax.f32 %v1266_v53, 0.0  ;;  %v1838_v12 = vpop.f32.mrb[80].mxu1 }
 0x463   : > { %v1839_v62 = vpop.f32.mrb[81].mxu1 }
 0x464   : > { %v1840_v4 = vadd.f32 %v1839_v62, %v1838_v12  ;;  %v1841_v9 = vpop.f32.mrb[82].mxu1  ;;  %v1393_v60 = vpack.c.bf16 %v1342_v61, %v1341_v59 }
 0x465   : > { %v1842_v15 = vpop.f32.mrb[83].mxu1 }
 0x466   : > { %v1271_v16 = vadd.f32 %v1840_v4, %v2389_v14  ;;  %v1843_v22 = vadd.f32 %v1842_v15, %v1841_v9  ;;  %1880 = vmatprep.subr.bf16.mxu0 %v1393_v60 }
 0x467   : > { %1881 = vmatpush3.bf16.msra.mxu0 %v2399_v10 }
 0x468   : > { %v1274_v24 = vadd.f32 %v1843_v22, %v2389_v14  ;;  %v1343_v55 = vmax.f32 %v1271_v16, 0.0 }
 0x46a   : > { %v1344_v58 = vmax.f32 %v1274_v24, 0.0  ;;  %v1844_v0 = vpop.f32.mrb[84].mxu1 }
 0x46b   : > { %v1845_v1 = vpop.f32.mrb[85].mxu1 }
 0x46c   : > { %v1846_v7 = vadd.f32 %v1845_v1, %v1844_v0  ;;  %v1847_v13 = vpop.f32.mrb[86].mxu1  ;;  %v1394_v19 = vpack.c.bf16 %v1344_v58, %v1343_v55 }
 0x46d   : > { %v1848_v20 = vpop.f32.mrb[87].mxu1 }
 0x46e   : > { %v1279_v25 = vadd.f32 %v1846_v7, %v2389_v14  ;;  %v1849_v26 = vadd.f32 %v1848_v20, %v1847_v13  ;;  %1882 = vmatprep.subr.bf16.mxu0 %v1394_v19 }
 0x46f   : > { %1883 = vmatpush3.bf16.msra.mxu0 %v2412_v27 }
 0x470   : > { %v1282_v31 = vadd.f32 %v1849_v26, %v2389_v14  ;;  %v1345_v32 = vmax.f32 %v1279_v25, 0.0 }
 0x472   : > { %v1346_v10 = vmax.f32 %v1282_v31, 0.0  ;;  %v1850_v37 = vpop.f32.mrb[88].mxu1 }
 0x473   : > { %v1851_v38 = vpop.f32.mrb[89].mxu1 }
 0x474   : > { %v1852_v43 = vadd.f32 %v1851_v38, %v1850_v37  ;;  %v1853_v49 = vpop.f32.mrb[90].mxu1  ;;  %v1395_v50 = vpack.c.bf16 %v1346_v10, %v1345_v32  ;;  %v483_v32 = vld [vmem:[%s2497_s6] sm:$0xff]  ;;  %v2005_v10 = vmov 0.0  }
 0x475   : > { %v1854_v56 = vpop.f32.mrb[91].mxu1 }
 0x476   : > { %v1287_v57 = vadd.f32 %v1852_v43, %v2389_v14  ;;  %v1855_v11 = vadd.f32 %v1854_v56, %v1853_v49  ;;  %1884 = vmatprep.subr.bf16.mxu0 %v1395_v50 }
 0x477   : > { %1885 = vmatpush3.bf16.msra.mxu0 %v2416_v47 }
 0x478   : > { %v1290_v18 = vadd.f32 %v1855_v11, %v2389_v14  ;;  %v1347_v28 = vmax.f32 %v1287_v57, 0.0 }
 0x47a   : > { %v1348_v27 = vmax.f32 %v1290_v18, 0.0  ;;  %v1856_v29 = vpop.f32.mrb[92].mxu1  ;;  %v1616_v18 = vld [vmem:[%s2498_s7] ss:$0 sm:$0xff] }
 0x47b   : > { %v1857_v34 = vpop.f32.mrb[93].mxu1 }
 0x47c   : > { %v1858_v3 = vadd.f32 %v1857_v34, %v1856_v29  ;;  %v1859_v17 = vpop.f32.mrb[94].mxu1  ;;  %v1396_v23 = vpack.c.bf16 %v1348_v27, %v1347_v28 }
 0x47d   : > { %v1860_v5 = vpop.f32.mrb[95].mxu1 }
 0x47e   : > { %v1295_v30 = vadd.f32 %v1858_v3, %v2389_v14  ;;  %v1861_v33 = vadd.f32 %v1860_v5, %v1859_v17  ;;  %1886 = vmatprep.subr.bf16.mxu0 %v1396_v23 }
 0x47f   : > { %1887 = vmatpush3.bf16.msra.mxu0 %v2420_v54 }
 0x480   : > { %v1298_v35 = vadd.f32 %v1861_v33, %v2389_v14  ;;  %v1349_v36 = vmax.f32 %v1295_v30, 0.0 }
 0x482   : > { %v1350_v47 = vmax.f32 %v1298_v35, 0.0  ;;  %v1862_v39 = vpop.f32.mrb[96].mxu1 }
 0x483   : > { %v1863_v40 = vpop.f32.mrb[97].mxu1 }
 0x484   : > { %v1864_v41 = vadd.f32 %v1863_v40, %v1862_v39  ;;  %v1865_v45 = vpop.f32.mrb[98].mxu1  ;;  %v1397_v46 = vpack.c.bf16 %v1350_v47, %v1349_v36 }
 0x485   : > { %v1866_v48 = vpop.f32.mrb[99].mxu1 }
 0x486   : > { %v1303_v51 = vadd.f32 %v1864_v41, %v2389_v14  ;;  %v1867_v52 = vadd.f32 %v1866_v48, %v1865_v45  ;;  %1888 = vmatprep.subr.bf16.mxu0 %v1397_v46 }
 0x487   : > { %1889 = vmatpush3.bf16.msra.mxu0 %v2424_v8 }
 0x488   : > { %v1306_v53 = vadd.f32 %v1867_v52, %v2389_v14  ;;  %v1351_v59 = vmax.f32 %v1303_v51, 0.0 }
 0x48a   : > { %v1352_v54 = vmax.f32 %v1306_v53, 0.0  ;;  %v1868_v61 = vpop.f32.mrb[100].mxu1 }
 0x48b   : > { %v1869_v12 = vpop.f32.mrb[101].mxu1 }
 0x48c   : > { %v1870_v62 = vadd.f32 %v1869_v12, %v1868_v61  ;;  %v1871_v4 = vpop.f32.mrb[102].mxu1  ;;  %v1398_v9 = vpack.c.bf16 %v1352_v54, %v1351_v59 }
 0x48d   : > { %v1872_v60 = vpop.f32.mrb[103].mxu1 }
 0x48e   : > { %v1311_v15 = vadd.f32 %v1870_v62, %v2389_v14  ;;  %v1873_v16 = vadd.f32 %v1872_v60, %v1871_v4  ;;  %1890 = vmatprep.subr.bf16.mxu0 %v1398_v9 }
 0x48f   : > { %1891 = vmatpush3.bf16.msra.mxu0 %v2428_v44 }
 0x490   : > { %v1314_v22 = vadd.f32 %v1873_v16, %v2389_v14  ;;  %v1353_v24 = vmax.f32 %v1311_v15, 0.0 }
 0x492   : > { %v1354_v8 = vmax.f32 %v1314_v22, 0.0  ;;  %v1874_v55 = vpop.f32.mrb[104].mxu1 }
 0x493   : > { %v1875_v58 = vpop.f32.mrb[105].mxu1 }
 0x494   : > { %v1876_v0 = vadd.f32 %v1875_v58, %v1874_v55  ;;  %v1877_v1 = vpop.f32.mrb[106].mxu1  ;;  %v1399_v7 = vpack.c.bf16 %v1354_v8, %v1353_v24 }
 0x495   : > { %v1878_v13 = vpop.f32.mrb[107].mxu1 }
 0x496   : > { %v1319_v19 = vadd.f32 %v1876_v0, %v2389_v14  ;;  %v1879_v20 = vadd.f32 %v1878_v13, %v1877_v1  ;;  %1892 = vmatprep.subr.bf16.mxu0 %v1399_v7 }
 0x497   : > { %1893 = vmatpush3.bf16.msra.mxu0 %v2432_v6 }
 0x498   : > { %v1322_v25 = vadd.f32 %v1879_v20, %v2389_v14  ;;  %v1355_v26 = vmax.f32 %v1319_v19, 0.0  ;;  %v484_v14 = vld [vmem:[%s2497_s6 + $0x8] sm:$0xff] }
 0x499   : > { %v487_v6 = vpack.c.bf16 %v484_v14, %v483_v32 }
 0x49a   : > { %v1356_v44 = vmax.f32 %v1322_v25, 0.0 }
 0x49c   : > { %v1400_v31 = vpack.c.bf16 %v1356_v44, %v1355_v26 }
 0x49e   : > { %1894 = vmatprep.subr.bf16.mxu0 %v1400_v31 }
 0x49f   : > { %1895 = vmatpush3.bf16.msra.mxu0 %v2436_v42 }
 0x4a0   : > { %1975 = vmatprep.subr.bf16.mxu0 %v2005_v10 }
 0x4a2   : > { %1615 = vmatmul.mubr.msk.bf16.vlgmr.msra.gmra.mrb[84].mxu0 %vm1614_vm15, %v2004_v63  ;;  %v486_v63 = vld [vmem:[%s2497_s6 + $0x18] sm:$0xff] }
 0x4a3   : > { %1976 = vmatpush3.bf16.msra.mxu0 %v487_v6  ;;  %v488_v2 = vpack.c.bf16 %v486_v63, %v485_v21  ;;  %1979 = vmatprep.mubr.msk.bf16.mxu0 %vm2006_vm0, %v2005_v10 }
 0x4a4   : > { %1977 = vmatprep.subr.bf16.mxu0 %v2005_v10 }
 0x4a7   : > { %1978 = vmatpush3.bf16.msra.mxu0 %v488_v2 }
 0x575   : > { %v1896_v42 = vpop.f32.mrb[84].mxu0 }
 0x576   : > { %v1897_v37 = vpop.f32.mrb[85].mxu0 }
 0x577   : > { %v1898_v38 = vadd.f32 %v1897_v37, %v1896_v42  ;;  %v1899_v43 = vpop.f32.mrb[86].mxu0 }
 0x578   : > { %v1900_v49 = vpop.f32.mrb[87].mxu0 }
 0x579   : > { %v1901_v50 = vadd.f32 %v1900_v49, %v1899_v43  ;;  %v1442_v56 = vmul.f32 0.0625, %v1898_v38 }
 0x57b   : > { %v1443_v57 = vmul.f32 0.0625, %v1901_v50 }
 0x57d   : > { %v1444_v11 = vpack.c.bf16 %v1443_v57, %v1442_v56 }
 0x57f   : > { %1980 = vmatmul.mubr.msk.bf16.vlgmr.msra.gmra.mrb[88].mxu0 %vm931_vm1, %v1444_v11 }
 0x652   : > { %v1489_v28 = vpop.f32.mrb[88].mxu0 }
 0x653   : > { %v1490_v27 = vadd.f32 %v1616_v18, %v1489_v28  ;;  %v1981_v29 = vpop.f32.mrb[89].mxu0 }
 0x654   : > { %v1492_v34 = vpop.f32.mrb[90].mxu0 }
 0x655   : > { %1497 = vst.msk [vmem:[%s327_s29] sm:$0xff] %vm1496_vm2, %v1490_v27  ;;  %v1493_v3 = vadd.f32 %v1616_v18, %v1492_v34  ;;  %v1982_v17 = vpop.f32.mrb[91].mxu0 }
 0x657   : > { %1498 = vst.msk [vmem:[%s327_s29 + $0x8] sm:$0xff] %vm1496_vm2, %v1493_v3 }
 0x658 PF: > { %s18_s27 = sadd.s32 1, %s2002_s27  }
 0x659   : > { %p15_p6 = scmp.ge.s32.totalorder %s18_s27, 4  }
 0x65b   :  { %17 = sbr.rel (!%p15_p6) target bundleno = 1 (0x1), region = 85 }

</bundles_post_ra>
